<compile_context>
chip_gen: v5e
topology: v5e:2x2
jax: 0.10.0
libtpu: 0.0.40
codegen_flags: <defaults>
</compile_context>

<pallas_src>
import jax
import jax.numpy as jnp
from jax.experimental import pallas as pl
from jax.experimental.pallas import tpu as pltpu

# ---- GptConfig (small, deterministic, consistent with the module) ----
VOCAB_SIZE = 64
BLOCK_SIZE = 16
N_EMBD     = 32
N_HEAD     = 4
N_GROUPS   = 2
N_LAYER    = 2
HEAD_DIM   = N_EMBD // N_HEAD          # 8
NUM_KV     = N_HEAD // N_GROUPS        # 2
B, T       = 2, 8
BT         = B * T                     # 16 rows, kept flat throughout
S          = BT * N_HEAD               # 64 = flattened (head, batch, time) rows
EPS        = 1e-5                      # python floats only (nothing captured)
NEG_INF    = -1e30
LOGITS_PAD = 128                       # lane-dense padded logits width

# packed bf16 weight buffer: per-layer slots, all 128-lane-tile aligned
WQKV_OFF   = 0                         # (C, 3C)  = (32, 96)
FC1_OFF    = 128                       # (C, 4C)  = (32, 128)
WO_OFF     = 256                       # (C, C)   = (32, 32)
LMHEAD_OFF = 384                       # (C, 128) stored in layer-0 slot only
WROW_COLS  = 512

# packed f32 constant buffer rows
BIAS_ROW   = 0                         # (S, S) additive attention bias
HMASK_ROW  = S                         # (S, C) head-channel mask
SCALE_ROW  = 2 * S                     # 2*N_LAYER blocks of BT rows (LN scales)
CBUF_ROWS  = SCALE_ROW + 2 * N_LAYER * BT   # 192


def _ln(x, w=None):
    # F.layer_norm over last dim, eps=1e-5, optional weight (f32 math)
    mu = jnp.mean(x, axis=-1, keepdims=True)
    var = jnp.mean((x - mu) ** 2, axis=-1, keepdims=True)
    y = (x - mu) * jax.lax.rsqrt(var + EPS)
    return y if w is None else y * w


def gpt_forward_kernel(x_ref, wrow_ref, wcol_ref, cbuf_ref, logits_ref):
    x = x_ref[...]                                            # (BT, C) f32 residual
    bias = cbuf_ref[BIAS_ROW:BIAS_ROW + S, :]                 # (S, S) f32
    hmask = cbuf_ref[HMASK_ROW:HMASK_ROW + S, 0:N_EMBD]       # (S, C) f32

    for l in range(N_LAYER):
        # --- attention block (torch code overwrites x with its layernorm) ---
        sc_a = cbuf_ref[SCALE_ROW + (2 * l) * BT:
                        SCALE_ROW + (2 * l + 1) * BT, 0:N_EMBD]      # (BT, C)
        x = _ln(x, sc_a)                                             # (BT, C) f32
        qkv = jnp.dot(x.astype(jnp.bfloat16),
                      wrow_ref[l, :, WQKV_OFF:WQKV_OFF + 3 * N_EMBD],
                      preferred_element_type=jnp.float32)            # (BT, 3C) f32
        q = qkv[:, 0:N_EMBD]
        k = qkv[:, N_EMBD:2 * N_EMBD]
        v = qkv[:, 2 * N_EMBD:3 * N_EMBD]
        # Flattened (head, batch, time) rows via sublane tiling (lane dim stays
        # C=32, no minor-dim relayout).  Q/V are masked to their head's channel
        # slice; K is left unmasked — cross-head score columns are killed by
        # the additive bias.  1/sqrt(D) is already folded into the Q weights.
        qe = (jnp.concatenate([q] * N_HEAD, axis=0) * hmask).astype(jnp.bfloat16)
        ke = jnp.concatenate([k] * N_HEAD, axis=0).astype(jnp.bfloat16)
        ve = (jnp.concatenate([v] * N_HEAD, axis=0) * hmask).astype(jnp.bfloat16)
        att = jnp.einsum('qc,kc->qk', qe, ke,
                         preferred_element_type=jnp.float32) + bias  # (S, S) f32
        att = jnp.exp(att - jnp.max(att, axis=-1, keepdims=True))
        att = att * pl.reciprocal(jnp.sum(att, axis=-1, keepdims=True),
                                  approx=True)
        # dropout: eval mode -> identity
        ctx_e = jnp.dot(att.astype(jnp.bfloat16), ve,
                        preferred_element_type=jnp.float32)          # (S, C) f32
        # fold heads back: each head block has its context only in its own
        # channel slice -> sum the 4 aligned sublane blocks.
        ctx = (ctx_e[0:BT] + ctx_e[BT:2 * BT]
               + ctx_e[2 * BT:3 * BT] + ctx_e[3 * BT:4 * BT])        # (BT, C)
        x = x + jnp.dot(ctx.astype(jnp.bfloat16),
                        wrow_ref[l, :, WO_OFF:WO_OFF + N_EMBD],
                        preferred_element_type=jnp.float32)

        # --- MLP block ---
        sc_m = cbuf_ref[SCALE_ROW + (2 * l + 1) * BT:
                        SCALE_ROW + (2 * l + 2) * BT, 0:N_EMBD]
        x = _ln(x, sc_m)
        h = jnp.dot(x.astype(jnp.bfloat16),
                    wrow_ref[l, :, FC1_OFF:FC1_OFF + 4 * N_EMBD],
                    preferred_element_type=jnp.float32)              # (BT, 4C)
        h = jnp.maximum(h, 0.0)
        x = x + jnp.dot(h.astype(jnp.bfloat16), wcol_ref[l],
                        preferred_element_type=jnp.float32)

    # final LN (out_scale folded into lm_head rows wrapper-side)
    x = _ln(x)
    # lane-dense (BT, 128) store; zero padding sliced off outside the kernel
    logits_ref[...] = jnp.dot(x.astype(jnp.bfloat16),
                              wrow_ref[0, :, LMHEAD_OFF:LMHEAD_OFF + LOGITS_PAD],
                              preferred_element_type=jnp.float32)


def init_params(key):
    ks = jax.random.split(key, 8)
    return {
        'tok':      jax.random.normal(ks[0], (VOCAB_SIZE, N_EMBD), jnp.float32),
        'pos':      jax.random.normal(ks[1], (BLOCK_SIZE, N_EMBD), jnp.float32),
        'fc_in':    jax.random.normal(ks[2], (N_LAYER, N_EMBD, 4 * N_EMBD),
                                      jnp.float32) / N_EMBD ** 0.5,
        'fc_out':   jax.random.normal(ks[3], (N_LAYER, 4 * N_EMBD, N_EMBD),
                                      jnp.float32) / (4 * N_EMBD) ** 0.5,
        'q_proj':   jax.random.normal(ks[4], (N_LAYER, N_EMBD, N_GROUPS,
                                              NUM_KV, HEAD_DIM),
                                      jnp.float32) / N_EMBD ** 0.5,
        'kv_proj':  jax.random.normal(ks[5], (N_LAYER, 2, N_EMBD,
                                              NUM_KV, HEAD_DIM),
                                      jnp.float32) / N_EMBD ** 0.5,
        'out_proj': jax.random.normal(ks[6], (N_LAYER, N_EMBD, N_EMBD),
                                      jnp.float32) / (HEAD_DIM * N_HEAD) ** 0.5,
        'lm_head':  jax.random.normal(ks[7], (N_EMBD, VOCAB_SIZE),
                                      jnp.float32) / N_EMBD ** 0.5,
        'scale':    jnp.ones((N_LAYER, 2, N_EMBD), jnp.float32),
        'out_scale': jnp.ones((N_EMBD,), jnp.float32),
    }


def _glue_weights(p):
    """Wrapper-side weight packing into bf16 buffers with lane-aligned slots."""
    # Q columns ordered (group, kv_head, d) == query-head-major; fold in scale.
    wq = p['q_proj'].reshape(N_LAYER, N_EMBD, N_EMBD) * HEAD_DIM ** -0.5
    # query head h reads kv head (h % NUM_KV), matching the (g, kv_head) order.
    rep = jnp.arange(N_HEAD) % NUM_KV
    wk = p['kv_proj'][:, 0][:, :, rep, :].reshape(N_LAYER, N_EMBD, N_EMBD)
    wv = p['kv_proj'][:, 1][:, :, rep, :].reshape(N_LAYER, N_EMBD, N_EMBD)
    wqkv = jnp.concatenate([wq, wk, wv], axis=-1)                 # (L, C, 3C)
    # fold out_scale into lm_head rows; zero-pad to 128 lanes
    lm_head = jnp.pad(p['out_scale'][:, None] * p['lm_head'],
                      ((0, 0), (0, LOGITS_PAD - VOCAB_SIZE)))     # (C, 128)

    wrow = jnp.zeros((N_LAYER, N_EMBD, WROW_COLS), jnp.float32)
    wrow = wrow.at[:, :, WQKV_OFF:WQKV_OFF + 3 * N_EMBD].set(wqkv)
    wrow = wrow.at[:, :, FC1_OFF:FC1_OFF + 4 * N_EMBD].set(p['fc_in'])
    wrow = wrow.at[:, :, WO_OFF:WO_OFF + N_EMBD].set(p['out_proj'])
    wrow = wrow.at[0, :, LMHEAD_OFF:LMHEAD_OFF + LOGITS_PAD].set(lm_head)
    wcol = p['fc_out']                                            # (L, 4C, C)
    return wrow.astype(jnp.bfloat16), wcol.astype(jnp.bfloat16)


def _glue_constants(p):
    """Wrapper-side f32 constants: attention bias, head mask, LN scales."""
    s = jnp.arange(S)
    h, b, t = s // BT, (s % BT) // T, s % T
    valid = ((h[:, None] == h[None, :])            # same head
             & (b[:, None] == b[None, :])          # same batch
             & (t[None, :] <= t[:, None]))         # causal
    bias = jnp.where(valid, 0.0, NEG_INF).astype(jnp.float32)            # (S, S)
    hmask = (jnp.arange(N_EMBD)[None, :] // HEAD_DIM
             == h[:, None]).astype(jnp.float32)                          # (S, C)
    cbuf = jnp.zeros((CBUF_ROWS, S), jnp.float32)
    cbuf = cbuf.at[BIAS_ROW:BIAS_ROW + S, :].set(bias)
    cbuf = cbuf.at[HMASK_ROW:HMASK_ROW + S, 0:N_EMBD].set(hmask)
    scales = jnp.repeat(p['scale'].reshape(2 * N_LAYER, 1, N_EMBD), BT, axis=1)
    cbuf = cbuf.at[SCALE_ROW:SCALE_ROW + 2 * N_LAYER * BT, 0:N_EMBD].set(
        scales.reshape(2 * N_LAYER * BT, N_EMBD))
    return cbuf


@jax.jit
def gpt_forward(idx, p):
    wrow, wcol = _glue_weights(p)
    cbuf = _glue_constants(p)
    # token-embedding gather + position add wrapper-side (history_length == 0)
    x0 = p['tok'][idx.reshape(BT)] + jnp.tile(p['pos'][:T], (B, 1))   # (BT, C)
    vmem = lambda: pl.BlockSpec(memory_space=pltpu.MemorySpace.VMEM)
    logits = pl.pallas_call(
        gpt_forward_kernel,
        out_shape=jax.ShapeDtypeStruct((BT, LOGITS_PAD), jnp.float32),
        in_specs=[vmem(), vmem(), vmem(), vmem()],
        out_specs=vmem(),
    )(x0, wrow, wcol, cbuf)
    return logits[:, :VOCAB_SIZE].reshape(B, T, VOCAB_SIZE)


def reference_forward(idx, p):
    """Pure-JAX f32 mirror of the PyTorch forward (eval, no kv-cache)."""
    def ln(x, w):
        mu = jnp.mean(x, -1, keepdims=True)
        var = jnp.mean((x - mu) ** 2, -1, keepdims=True)
        return (x - mu) * jax.lax.rsqrt(var + EPS) * w

    x = p['tok'][idx] + p['pos'][:T]
    causal = jnp.tril(jnp.ones((T, T), bool))[None, None, None]
    for l in range(N_LAYER):
        x = ln(x, p['scale'][l, 0])
        q = jnp.einsum('btc,cghd->bghtd', x, p['q_proj'][l])
        kv = jnp.einsum('btc,schd->sbhtd', x, p['kv_proj'][l])
        k, v = kv[0], kv[1]
        att = jnp.einsum('bghqd,bhkd->bghqk', q, k) * HEAD_DIM ** -0.5
        att = jnp.where(causal, att, NEG_INF)
        att = jax.nn.softmax(att, axis=-1)
        out = jnp.einsum('bghqk,bhkd->bghqd', att, v)
        out = out.transpose(0, 3, 1, 2, 4).reshape(B, T, N_EMBD)
        out = out @ p['out_proj'][l]
        x = x + out
        x = ln(x, p['scale'][l, 1])
        h = jax.nn.relu(x @ p['fc_in'][l])
        x = x + h @ p['fc_out'][l]
    x = ln(x, p['out_scale'])
    return x @ p['lm_head']


if __name__ == "__main__":
    key = jax.random.PRNGKey(0)
    pkey, ikey = jax.random.split(key)
    params = init_params(pkey)
    idx = jax.random.randint(ikey, (B, T), 0, VOCAB_SIZE, dtype=jnp.int32)

    logits = gpt_forward(idx, params)
    jax.block_until_ready(logits)

    ref = reference_forward(idx, params)
    assert logits.shape == (B, T, VOCAB_SIZE)
    max_err = float(jnp.max(jnp.abs(logits - ref)))
    # bf16 MXU operands + approx reciprocal vs f32 reference: expected ~1e-2;
    # a structural bug would give O(1) errors, so 1e-1 still catches real bugs.
    assert max_err < 1e-1, f"max abs err {max_err}"
    print("KERNEL_OK")
</pallas_src>

<mosaic_0001>
module attributes {stable_mosaic.version = 11 : i64} {
  func.func @gpt_forward_kernel(%arg0: memref<16x32xf32, #tpu.memory_space<vmem>>, %arg1: memref<2x32x512xbf16, #tpu.memory_space<vmem>>, %arg2: memref<2x128x32xbf16, #tpu.memory_space<vmem>>, %arg3: memref<192x64xf32, #tpu.memory_space<vmem>>, %arg4: memref<16x128xf32, #tpu.memory_space<vmem>>) attributes {dimension_semantics = [], scalar_prefetch = 0 : i64, scratch_operands = 0 : i64, tpu.core_type = #tpu.core_type<tc>} {
    %c0 = arith.constant 0 : index
    %c0_0 = arith.constant 0 : index
    %0 = vector.load %arg0[%c0, %c0_0] : memref<16x32xf32, #tpu.memory_space<vmem>>, vector<16x32xf32>
    %c0_1 = arith.constant 0 : index
    %c0_2 = arith.constant 0 : index
    %1 = vector.load %arg3[%c0_1, %c0_2] : memref<192x64xf32, #tpu.memory_space<vmem>>, vector<64x64xf32>
    %c64 = arith.constant 64 : index
    %c0_3 = arith.constant 0 : index
    %2 = vector.load %arg3[%c64, %c0_3] : memref<192x64xf32, #tpu.memory_space<vmem>>, vector<64x32xf32>
    %c128 = arith.constant 128 : index
    %c0_4 = arith.constant 0 : index
    %3 = vector.load %arg3[%c128, %c0_4] : memref<192x64xf32, #tpu.memory_space<vmem>>, vector<16x32xf32>
    %cst = arith.constant dense<0.000000e+00> : vector<16xf32>
    %4 = vector.multi_reduction <add>, %0, %cst [1] : vector<16x32xf32> to vector<16xf32>
    %5 = vector.shape_cast %4 : vector<16xf32> to vector<16x1xf32>
    %cst_5 = arith.constant 3.200000e+01 : f32
    %6 = vector.broadcast %cst_5 : f32 to vector<16x1xf32>
    %7 = arith.divf %5, %6 : vector<16x1xf32>
    %8 = vector.broadcast %7 : vector<16x1xf32> to vector<16x32xf32>
    %9 = arith.subf %0, %8 : vector<16x32xf32>
    %10 = arith.mulf %9, %9 : vector<16x32xf32>
    %cst_6 = arith.constant dense<0.000000e+00> : vector<16xf32>
    %11 = vector.multi_reduction <add>, %10, %cst_6 [1] : vector<16x32xf32> to vector<16xf32>
    %12 = vector.shape_cast %11 : vector<16xf32> to vector<16x1xf32>
    %cst_7 = arith.constant 3.200000e+01 : f32
    %13 = vector.broadcast %cst_7 : f32 to vector<16x1xf32>
    %14 = arith.divf %12, %13 : vector<16x1xf32>
    %15 = vector.broadcast %7 : vector<16x1xf32> to vector<16x32xf32>
    %16 = arith.subf %0, %15 : vector<16x32xf32>
    %cst_8 = arith.constant 9.99999974E-6 : f32
    %17 = vector.broadcast %cst_8 : f32 to vector<16x1xf32>
    %18 = arith.addf %14, %17 : vector<16x1xf32>
    %19 = math.rsqrt %18 : vector<16x1xf32>
    %20 = vector.broadcast %19 : vector<16x1xf32> to vector<16x32xf32>
    %21 = arith.mulf %16, %20 : vector<16x32xf32>
    %22 = arith.mulf %21, %3 : vector<16x32xf32>
    %23 = arith.truncf %22 : vector<16x32xf32> to vector<16x32xbf16>
    %c0_9 = arith.constant 0 : index
    %c0_10 = arith.constant 0 : index
    %c0_11 = arith.constant 0 : index
    %24 = vector.load %arg1[%c0_9, %c0_10, %c0_11] : memref<2x32x512xbf16, #tpu.memory_space<vmem>>, vector<1x32x96xbf16>
    %25 = vector.shape_cast %24 : vector<1x32x96xbf16> to vector<32x96xbf16>
    %cst_12 = arith.constant dense<0.000000e+00> : vector<16x96xf32>
    %26 = tpu.matmul %23, %25, %cst_12 {dimension_numbers = #tpu.dot_dimension_numbers<[1], [0], [0], [1], [0, 0, 1, 1], [], []>} : vector<16x32xbf16>, vector<32x96xbf16>, vector<16x96xf32> -> vector<16x96xf32>
    %27 = vector.extract_strided_slice %26 {offsets = [0, 0], sizes = [16, 32], strides = [1, 1]} : vector<16x96xf32> to vector<16x32xf32>
    %28 = vector.extract_strided_slice %26 {offsets = [0, 32], sizes = [16, 32], strides = [1, 1]} : vector<16x96xf32> to vector<16x32xf32>
    %29 = vector.extract_strided_slice %26 {offsets = [0, 64], sizes = [16, 32], strides = [1, 1]} : vector<16x96xf32> to vector<16x32xf32>
    %30 = tpu.concatenate %27, %27, %27, %27 in 0 : vector<16x32xf32>, vector<16x32xf32>, vector<16x32xf32>, vector<16x32xf32> -> vector<64x32xf32>
    %31 = arith.mulf %30, %2 : vector<64x32xf32>
    %32 = arith.truncf %31 : vector<64x32xf32> to vector<64x32xbf16>
    %33 = tpu.concatenate %28, %28, %28, %28 in 0 : vector<16x32xf32>, vector<16x32xf32>, vector<16x32xf32>, vector<16x32xf32> -> vector<64x32xf32>
    %34 = arith.truncf %33 : vector<64x32xf32> to vector<64x32xbf16>
    %35 = tpu.concatenate %29, %29, %29, %29 in 0 : vector<16x32xf32>, vector<16x32xf32>, vector<16x32xf32>, vector<16x32xf32> -> vector<64x32xf32>
    %36 = arith.mulf %35, %2 : vector<64x32xf32>
    %37 = arith.truncf %36 : vector<64x32xf32> to vector<64x32xbf16>
    "tpu.trace_start"() <{level = 10 : i32, message = "qc,kc->qk"}> : () -> ()
    %cst_13 = arith.constant dense<0.000000e+00> : vector<64x64xf32>
    %38 = tpu.matmul %32, %34, %cst_13 {dimension_numbers = #tpu.dot_dimension_numbers<[1], [1], [0], [0], [0, 0, 1, 0], [], []>} : vector<64x32xbf16>, vector<64x32xbf16>, vector<64x64xf32> -> vector<64x64xf32>
    "tpu.trace_stop"() : () -> ()
    %39 = arith.addf %38, %1 : vector<64x64xf32>
    %cst_14 = arith.constant dense<0xFF800000> : vector<64xf32>
    %40 = vector.multi_reduction <maximumf>, %39, %cst_14 [1] : vector<64x64xf32> to vector<64xf32>
    %41 = vector.shape_cast %40 : vector<64xf32> to vector<64x1xf32>
    %42 = vector.broadcast %41 : vector<64x1xf32> to vector<64x64xf32>
    %43 = arith.subf %39, %42 : vector<64x64xf32>
    %44 = math.exp %43 : vector<64x64xf32>
    %cst_15 = arith.constant dense<0.000000e+00> : vector<64xf32>
    %45 = vector.multi_reduction <add>, %44, %cst_15 [1] : vector<64x64xf32> to vector<64xf32>
    %46 = vector.shape_cast %45 : vector<64xf32> to vector<64x1xf32>
    %47 = tpu.reciprocal %46 {approx = true} : vector<64x1xf32> -> vector<64x1xf32>
    %48 = vector.broadcast %47 : vector<64x1xf32> to vector<64x64xf32>
    %49 = arith.mulf %44, %48 : vector<64x64xf32>
    %50 = arith.truncf %49 : vector<64x64xf32> to vector<64x64xbf16>
    %cst_16 = arith.constant dense<0.000000e+00> : vector<64x32xf32>
    %51 = tpu.matmul %50, %37, %cst_16 {dimension_numbers = #tpu.dot_dimension_numbers<[1], [0], [0], [1], [0, 0, 1, 1], [], []>} : vector<64x64xbf16>, vector<64x32xbf16>, vector<64x32xf32> -> vector<64x32xf32>
    %52 = vector.extract_strided_slice %51 {offsets = [0, 0], sizes = [16, 32], strides = [1, 1]} : vector<64x32xf32> to vector<16x32xf32>
    %53 = vector.extract_strided_slice %51 {offsets = [16, 0], sizes = [16, 32], strides = [1, 1]} : vector<64x32xf32> to vector<16x32xf32>
    %54 = arith.addf %52, %53 : vector<16x32xf32>
    %55 = vector.extract_strided_slice %51 {offsets = [32, 0], sizes = [16, 32], strides = [1, 1]} : vector<64x32xf32> to vector<16x32xf32>
    %56 = arith.addf %54, %55 : vector<16x32xf32>
    %57 = vector.extract_strided_slice %51 {offsets = [48, 0], sizes = [16, 32], strides = [1, 1]} : vector<64x32xf32> to vector<16x32xf32>
    %58 = arith.addf %56, %57 : vector<16x32xf32>
    %59 = arith.truncf %58 : vector<16x32xf32> to vector<16x32xbf16>
    %c0_17 = arith.constant 0 : index
    %c0_18 = arith.constant 0 : index
    %c256 = arith.constant 256 : index
    %60 = vector.load %arg1[%c0_17, %c0_18, %c256] : memref<2x32x512xbf16, #tpu.memory_space<vmem>>, vector<1x32x32xbf16>
    %61 = vector.shape_cast %60 : vector<1x32x32xbf16> to vector<32x32xbf16>
    %cst_19 = arith.constant dense<0.000000e+00> : vector<16x32xf32>
    %62 = tpu.matmul %59, %61, %cst_19 {dimension_numbers = #tpu.dot_dimension_numbers<[1], [0], [0], [1], [0, 0, 1, 1], [], []>} : vector<16x32xbf16>, vector<32x32xbf16>, vector<16x32xf32> -> vector<16x32xf32>
    %63 = arith.addf %22, %62 : vector<16x32xf32>
    %c144 = arith.constant 144 : index
    %c0_20 = arith.constant 0 : index
    %64 = vector.load %arg3[%c144, %c0_20] : memref<192x64xf32, #tpu.memory_space<vmem>>, vector<16x32xf32>
    %cst_21 = arith.constant dense<0.000000e+00> : vector<16xf32>
    %65 = vector.multi_reduction <add>, %63, %cst_21 [1] : vector<16x32xf32> to vector<16xf32>
    %66 = vector.shape_cast %65 : vector<16xf32> to vector<16x1xf32>
    %cst_22 = arith.constant 3.200000e+01 : f32
    %67 = vector.broadcast %cst_22 : f32 to vector<16x1xf32>
    %68 = arith.divf %66, %67 : vector<16x1xf32>
    %69 = vector.broadcast %68 : vector<16x1xf32> to vector<16x32xf32>
    %70 = arith.subf %63, %69 : vector<16x32xf32>
    %71 = arith.mulf %70, %70 : vector<16x32xf32>
    %cst_23 = arith.constant dense<0.000000e+00> : vector<16xf32>
    %72 = vector.multi_reduction <add>, %71, %cst_23 [1] : vector<16x32xf32> to vector<16xf32>
    %73 = vector.shape_cast %72 : vector<16xf32> to vector<16x1xf32>
    %cst_24 = arith.constant 3.200000e+01 : f32
    %74 = vector.broadcast %cst_24 : f32 to vector<16x1xf32>
    %75 = arith.divf %73, %74 : vector<16x1xf32>
    %76 = vector.broadcast %68 : vector<16x1xf32> to vector<16x32xf32>
    %77 = arith.subf %63, %76 : vector<16x32xf32>
    %cst_25 = arith.constant 9.99999974E-6 : f32
    %78 = vector.broadcast %cst_25 : f32 to vector<16x1xf32>
    %79 = arith.addf %75, %78 : vector<16x1xf32>
    %80 = math.rsqrt %79 : vector<16x1xf32>
    %81 = vector.broadcast %80 : vector<16x1xf32> to vector<16x32xf32>
    %82 = arith.mulf %77, %81 : vector<16x32xf32>
    %83 = arith.mulf %82, %64 : vector<16x32xf32>
    %84 = arith.truncf %83 : vector<16x32xf32> to vector<16x32xbf16>
    %c0_26 = arith.constant 0 : index
    %c0_27 = arith.constant 0 : index
    %c128_28 = arith.constant 128 : index
    %85 = vector.load %arg1[%c0_26, %c0_27, %c128_28] : memref<2x32x512xbf16, #tpu.memory_space<vmem>>, vector<1x32x128xbf16>
    %86 = vector.shape_cast %85 : vector<1x32x128xbf16> to vector<32x128xbf16>
    %cst_29 = arith.constant dense<0.000000e+00> : vector<16x128xf32>
    %87 = tpu.matmul %84, %86, %cst_29 {dimension_numbers = #tpu.dot_dimension_numbers<[1], [0], [0], [1], [0, 0, 1, 1], [], []>} : vector<16x32xbf16>, vector<32x128xbf16>, vector<16x128xf32> -> vector<16x128xf32>
    %cst_30 = arith.constant 0.000000e+00 : f32
    %88 = vector.broadcast %cst_30 : f32 to vector<16x128xf32>
    %89 = arith.maximumf %87, %88 : vector<16x128xf32>
    %90 = arith.truncf %89 : vector<16x128xf32> to vector<16x128xbf16>
    %c0_31 = arith.constant 0 : index
    %c0_32 = arith.constant 0 : index
    %c0_33 = arith.constant 0 : index
    %91 = vector.load %arg2[%c0_31, %c0_32, %c0_33] : memref<2x128x32xbf16, #tpu.memory_space<vmem>>, vector<1x128x32xbf16>
    %92 = vector.shape_cast %91 : vector<1x128x32xbf16> to vector<128x32xbf16>
    %cst_34 = arith.constant dense<0.000000e+00> : vector<16x32xf32>
    %93 = tpu.matmul %90, %92, %cst_34 {dimension_numbers = #tpu.dot_dimension_numbers<[1], [0], [0], [1], [0, 0, 1, 1], [], []>} : vector<16x128xbf16>, vector<128x32xbf16>, vector<16x32xf32> -> vector<16x32xf32>
    %94 = arith.addf %83, %93 : vector<16x32xf32>
    %c160 = arith.constant 160 : index
    %c0_35 = arith.constant 0 : index
    %95 = vector.load %arg3[%c160, %c0_35] : memref<192x64xf32, #tpu.memory_space<vmem>>, vector<16x32xf32>
    %cst_36 = arith.constant dense<0.000000e+00> : vector<16xf32>
    %96 = vector.multi_reduction <add>, %94, %cst_36 [1] : vector<16x32xf32> to vector<16xf32>
    %97 = vector.shape_cast %96 : vector<16xf32> to vector<16x1xf32>
    %cst_37 = arith.constant 3.200000e+01 : f32
    %98 = vector.broadcast %cst_37 : f32 to vector<16x1xf32>
    %99 = arith.divf %97, %98 : vector<16x1xf32>
    %100 = vector.broadcast %99 : vector<16x1xf32> to vector<16x32xf32>
    %101 = arith.subf %94, %100 : vector<16x32xf32>
    %102 = arith.mulf %101, %101 : vector<16x32xf32>
    %cst_38 = arith.constant dense<0.000000e+00> : vector<16xf32>
    %103 = vector.multi_reduction <add>, %102, %cst_38 [1] : vector<16x32xf32> to vector<16xf32>
    %104 = vector.shape_cast %103 : vector<16xf32> to vector<16x1xf32>
    %cst_39 = arith.constant 3.200000e+01 : f32
    %105 = vector.broadcast %cst_39 : f32 to vector<16x1xf32>
    %106 = arith.divf %104, %105 : vector<16x1xf32>
    %107 = vector.broadcast %99 : vector<16x1xf32> to vector<16x32xf32>
    %108 = arith.subf %94, %107 : vector<16x32xf32>
    %cst_40 = arith.constant 9.99999974E-6 : f32
    %109 = vector.broadcast %cst_40 : f32 to vector<16x1xf32>
    %110 = arith.addf %106, %109 : vector<16x1xf32>
    %111 = math.rsqrt %110 : vector<16x1xf32>
    %112 = vector.broadcast %111 : vector<16x1xf32> to vector<16x32xf32>
    %113 = arith.mulf %108, %112 : vector<16x32xf32>
    %114 = arith.mulf %113, %95 : vector<16x32xf32>
    %115 = arith.truncf %114 : vector<16x32xf32> to vector<16x32xbf16>
    %c1 = arith.constant 1 : index
    %c0_41 = arith.constant 0 : index
    %c0_42 = arith.constant 0 : index
    %116 = vector.load %arg1[%c1, %c0_41, %c0_42] : memref<2x32x512xbf16, #tpu.memory_space<vmem>>, vector<1x32x96xbf16>
    %117 = vector.shape_cast %116 : vector<1x32x96xbf16> to vector<32x96xbf16>
    %cst_43 = arith.constant dense<0.000000e+00> : vector<16x96xf32>
    %118 = tpu.matmul %115, %117, %cst_43 {dimension_numbers = #tpu.dot_dimension_numbers<[1], [0], [0], [1], [0, 0, 1, 1], [], []>} : vector<16x32xbf16>, vector<32x96xbf16>, vector<16x96xf32> -> vector<16x96xf32>
    %119 = vector.extract_strided_slice %118 {offsets = [0, 0], sizes = [16, 32], strides = [1, 1]} : vector<16x96xf32> to vector<16x32xf32>
    %120 = vector.extract_strided_slice %118 {offsets = [0, 32], sizes = [16, 32], strides = [1, 1]} : vector<16x96xf32> to vector<16x32xf32>
    %121 = vector.extract_strided_slice %118 {offsets = [0, 64], sizes = [16, 32], strides = [1, 1]} : vector<16x96xf32> to vector<16x32xf32>
    %122 = tpu.concatenate %119, %119, %119, %119 in 0 : vector<16x32xf32>, vector<16x32xf32>, vector<16x32xf32>, vector<16x32xf32> -> vector<64x32xf32>
    %123 = arith.mulf %122, %2 : vector<64x32xf32>
    %124 = arith.truncf %123 : vector<64x32xf32> to vector<64x32xbf16>
    %125 = tpu.concatenate %120, %120, %120, %120 in 0 : vector<16x32xf32>, vector<16x32xf32>, vector<16x32xf32>, vector<16x32xf32> -> vector<64x32xf32>
    %126 = arith.truncf %125 : vector<64x32xf32> to vector<64x32xbf16>
    %127 = tpu.concatenate %121, %121, %121, %121 in 0 : vector<16x32xf32>, vector<16x32xf32>, vector<16x32xf32>, vector<16x32xf32> -> vector<64x32xf32>
    %128 = arith.mulf %127, %2 : vector<64x32xf32>
    %129 = arith.truncf %128 : vector<64x32xf32> to vector<64x32xbf16>
    "tpu.trace_start"() <{level = 10 : i32, message = "qc,kc->qk"}> : () -> ()
    %cst_44 = arith.constant dense<0.000000e+00> : vector<64x64xf32>
    %130 = tpu.matmul %124, %126, %cst_44 {dimension_numbers = #tpu.dot_dimension_numbers<[1], [1], [0], [0], [0, 0, 1, 0], [], []>} : vector<64x32xbf16>, vector<64x32xbf16>, vector<64x64xf32> -> vector<64x64xf32>
    "tpu.trace_stop"() : () -> ()
    %131 = arith.addf %130, %1 : vector<64x64xf32>
    %cst_45 = arith.constant dense<0xFF800000> : vector<64xf32>
    %132 = vector.multi_reduction <maximumf>, %131, %cst_45 [1] : vector<64x64xf32> to vector<64xf32>
    %133 = vector.shape_cast %132 : vector<64xf32> to vector<64x1xf32>
    %134 = vector.broadcast %133 : vector<64x1xf32> to vector<64x64xf32>
    %135 = arith.subf %131, %134 : vector<64x64xf32>
    %136 = math.exp %135 : vector<64x64xf32>
    %cst_46 = arith.constant dense<0.000000e+00> : vector<64xf32>
    %137 = vector.multi_reduction <add>, %136, %cst_46 [1] : vector<64x64xf32> to vector<64xf32>
    %138 = vector.shape_cast %137 : vector<64xf32> to vector<64x1xf32>
    %139 = tpu.reciprocal %138 {approx = true} : vector<64x1xf32> -> vector<64x1xf32>
    %140 = vector.broadcast %139 : vector<64x1xf32> to vector<64x64xf32>
    %141 = arith.mulf %136, %140 : vector<64x64xf32>
    %142 = arith.truncf %141 : vector<64x64xf32> to vector<64x64xbf16>
    %cst_47 = arith.constant dense<0.000000e+00> : vector<64x32xf32>
    %143 = tpu.matmul %142, %129, %cst_47 {dimension_numbers = #tpu.dot_dimension_numbers<[1], [0], [0], [1], [0, 0, 1, 1], [], []>} : vector<64x64xbf16>, vector<64x32xbf16>, vector<64x32xf32> -> vector<64x32xf32>
    %144 = vector.extract_strided_slice %143 {offsets = [0, 0], sizes = [16, 32], strides = [1, 1]} : vector<64x32xf32> to vector<16x32xf32>
    %145 = vector.extract_strided_slice %143 {offsets = [16, 0], sizes = [16, 32], strides = [1, 1]} : vector<64x32xf32> to vector<16x32xf32>
    %146 = arith.addf %144, %145 : vector<16x32xf32>
    %147 = vector.extract_strided_slice %143 {offsets = [32, 0], sizes = [16, 32], strides = [1, 1]} : vector<64x32xf32> to vector<16x32xf32>
    %148 = arith.addf %146, %147 : vector<16x32xf32>
    %149 = vector.extract_strided_slice %143 {offsets = [48, 0], sizes = [16, 32], strides = [1, 1]} : vector<64x32xf32> to vector<16x32xf32>
    %150 = arith.addf %148, %149 : vector<16x32xf32>
    %151 = arith.truncf %150 : vector<16x32xf32> to vector<16x32xbf16>
    %c1_48 = arith.constant 1 : index
    %c0_49 = arith.constant 0 : index
    %c256_50 = arith.constant 256 : index
    %152 = vector.load %arg1[%c1_48, %c0_49, %c256_50] : memref<2x32x512xbf16, #tpu.memory_space<vmem>>, vector<1x32x32xbf16>
    %153 = vector.shape_cast %152 : vector<1x32x32xbf16> to vector<32x32xbf16>
    %cst_51 = arith.constant dense<0.000000e+00> : vector<16x32xf32>
    %154 = tpu.matmul %151, %153, %cst_51 {dimension_numbers = #tpu.dot_dimension_numbers<[1], [0], [0], [1], [0, 0, 1, 1], [], []>} : vector<16x32xbf16>, vector<32x32xbf16>, vector<16x32xf32> -> vector<16x32xf32>
    %155 = arith.addf %114, %154 : vector<16x32xf32>
    %c176 = arith.constant 176 : index
    %c0_52 = arith.constant 0 : index
    %156 = vector.load %arg3[%c176, %c0_52] : memref<192x64xf32, #tpu.memory_space<vmem>>, vector<16x32xf32>
    %cst_53 = arith.constant dense<0.000000e+00> : vector<16xf32>
    %157 = vector.multi_reduction <add>, %155, %cst_53 [1] : vector<16x32xf32> to vector<16xf32>
    %158 = vector.shape_cast %157 : vector<16xf32> to vector<16x1xf32>
    %cst_54 = arith.constant 3.200000e+01 : f32
    %159 = vector.broadcast %cst_54 : f32 to vector<16x1xf32>
    %160 = arith.divf %158, %159 : vector<16x1xf32>
    %161 = vector.broadcast %160 : vector<16x1xf32> to vector<16x32xf32>
    %162 = arith.subf %155, %161 : vector<16x32xf32>
    %163 = arith.mulf %162, %162 : vector<16x32xf32>
    %cst_55 = arith.constant dense<0.000000e+00> : vector<16xf32>
    %164 = vector.multi_reduction <add>, %163, %cst_55 [1] : vector<16x32xf32> to vector<16xf32>
    %165 = vector.shape_cast %164 : vector<16xf32> to vector<16x1xf32>
    %cst_56 = arith.constant 3.200000e+01 : f32
    %166 = vector.broadcast %cst_56 : f32 to vector<16x1xf32>
    %167 = arith.divf %165, %166 : vector<16x1xf32>
    %168 = vector.broadcast %160 : vector<16x1xf32> to vector<16x32xf32>
    %169 = arith.subf %155, %168 : vector<16x32xf32>
    %cst_57 = arith.constant 9.99999974E-6 : f32
    %170 = vector.broadcast %cst_57 : f32 to vector<16x1xf32>
    %171 = arith.addf %167, %170 : vector<16x1xf32>
    %172 = math.rsqrt %171 : vector<16x1xf32>
    %173 = vector.broadcast %172 : vector<16x1xf32> to vector<16x32xf32>
    %174 = arith.mulf %169, %173 : vector<16x32xf32>
    %175 = arith.mulf %174, %156 : vector<16x32xf32>
    %176 = arith.truncf %175 : vector<16x32xf32> to vector<16x32xbf16>
    %c1_58 = arith.constant 1 : index
    %c0_59 = arith.constant 0 : index
    %c128_60 = arith.constant 128 : index
    %177 = vector.load %arg1[%c1_58, %c0_59, %c128_60] : memref<2x32x512xbf16, #tpu.memory_space<vmem>>, vector<1x32x128xbf16>
    %178 = vector.shape_cast %177 : vector<1x32x128xbf16> to vector<32x128xbf16>
    %cst_61 = arith.constant dense<0.000000e+00> : vector<16x128xf32>
    %179 = tpu.matmul %176, %178, %cst_61 {dimension_numbers = #tpu.dot_dimension_numbers<[1], [0], [0], [1], [0, 0, 1, 1], [], []>} : vector<16x32xbf16>, vector<32x128xbf16>, vector<16x128xf32> -> vector<16x128xf32>
    %cst_62 = arith.constant 0.000000e+00 : f32
    %180 = vector.broadcast %cst_62 : f32 to vector<16x128xf32>
    %181 = arith.maximumf %179, %180 : vector<16x128xf32>
    %182 = arith.truncf %181 : vector<16x128xf32> to vector<16x128xbf16>
    %c1_63 = arith.constant 1 : index
    %c0_64 = arith.constant 0 : index
    %c0_65 = arith.constant 0 : index
    %183 = vector.load %arg2[%c1_63, %c0_64, %c0_65] : memref<2x128x32xbf16, #tpu.memory_space<vmem>>, vector<1x128x32xbf16>
    %184 = vector.shape_cast %183 : vector<1x128x32xbf16> to vector<128x32xbf16>
    %cst_66 = arith.constant dense<0.000000e+00> : vector<16x32xf32>
    %185 = tpu.matmul %182, %184, %cst_66 {dimension_numbers = #tpu.dot_dimension_numbers<[1], [0], [0], [1], [0, 0, 1, 1], [], []>} : vector<16x128xbf16>, vector<128x32xbf16>, vector<16x32xf32> -> vector<16x32xf32>
    %186 = arith.addf %175, %185 : vector<16x32xf32>
    %cst_67 = arith.constant dense<0.000000e+00> : vector<16xf32>
    %187 = vector.multi_reduction <add>, %186, %cst_67 [1] : vector<16x32xf32> to vector<16xf32>
    %188 = vector.shape_cast %187 : vector<16xf32> to vector<16x1xf32>
    %cst_68 = arith.constant 3.200000e+01 : f32
    %189 = vector.broadcast %cst_68 : f32 to vector<16x1xf32>
    %190 = arith.divf %188, %189 : vector<16x1xf32>
    %191 = vector.broadcast %190 : vector<16x1xf32> to vector<16x32xf32>
    %192 = arith.subf %186, %191 : vector<16x32xf32>
    %193 = arith.mulf %192, %192 : vector<16x32xf32>
    %cst_69 = arith.constant dense<0.000000e+00> : vector<16xf32>
    %194 = vector.multi_reduction <add>, %193, %cst_69 [1] : vector<16x32xf32> to vector<16xf32>
    %195 = vector.shape_cast %194 : vector<16xf32> to vector<16x1xf32>
    %cst_70 = arith.constant 3.200000e+01 : f32
    %196 = vector.broadcast %cst_70 : f32 to vector<16x1xf32>
    %197 = arith.divf %195, %196 : vector<16x1xf32>
    %198 = vector.broadcast %190 : vector<16x1xf32> to vector<16x32xf32>
    %199 = arith.subf %186, %198 : vector<16x32xf32>
    %cst_71 = arith.constant 9.99999974E-6 : f32
    %200 = vector.broadcast %cst_71 : f32 to vector<16x1xf32>
    %201 = arith.addf %197, %200 : vector<16x1xf32>
    %202 = math.rsqrt %201 : vector<16x1xf32>
    %203 = vector.broadcast %202 : vector<16x1xf32> to vector<16x32xf32>
    %204 = arith.mulf %199, %203 : vector<16x32xf32>
    %205 = arith.truncf %204 : vector<16x32xf32> to vector<16x32xbf16>
    %c0_72 = arith.constant 0 : index
    %c0_73 = arith.constant 0 : index
    %c384 = arith.constant 384 : index
    %206 = vector.load %arg1[%c0_72, %c0_73, %c384] : memref<2x32x512xbf16, #tpu.memory_space<vmem>>, vector<1x32x128xbf16>
    %207 = vector.shape_cast %206 : vector<1x32x128xbf16> to vector<32x128xbf16>
    %cst_74 = arith.constant dense<0.000000e+00> : vector<16x128xf32>
    %208 = tpu.matmul %205, %207, %cst_74 {dimension_numbers = #tpu.dot_dimension_numbers<[1], [0], [0], [1], [0, 0, 1, 1], [], []>} : vector<16x32xbf16>, vector<32x128xbf16>, vector<16x128xf32> -> vector<16x128xf32>
    %c0_75 = arith.constant 0 : index
    %c0_76 = arith.constant 0 : index
    %209 = vector.load %arg4[%c0_75, %c0_76] : memref<16x128xf32, #tpu.memory_space<vmem>>, vector<16x128xf32>
    tpu.vector_store %arg4[%c0_75, %c0_76], %208 {strides = array<i32>} : memref<16x128xf32, #tpu.memory_space<vmem>>, vector<16x128xf32>,
    return
  }
}

</mosaic_0001>

<bundles_post_ra>
// kernel: gpt_forward.1
= control target key start
LH: loop header
LB: loop body
LE: loop exit
PB: predicated region body
PF: predicated region fallthrough
CT: control target
= control target key end

     0   :  { %vm38_vm0 = vcmask 261120   ;;  %v1473_v4 = vmov 32.0   ;;  %s1474_s28 = smov 64   ;;  %s1475_s15 = smov 96   ;;  %vm230_vm8 = vcmask 523264   ;;  %s2026_s0 = inlined_call_operand.vmem [shape: f32[16,32], index: 0, kind: input, shape index: {}]   ;;  %s2027_s1 = inlined_call_operand.vmem [shape: bf16[2,32,512], index: 1, kind: input, shape index: {}]   ;;  %s2028_s3 = inlined_call_operand.vmem [shape: f32[192,64], index: 3, kind: input, shape index: {}]   ;;  %s2029_s2 = inlined_call_operand.vmem [shape: bf16[2,128,32], index: 2, kind: input, shape index: {}]   ;;  %s2030_s4 = inlined_call_operand.vmem [shape: f32[16,128], index: 4, kind: output, shape index: {}]  }
   0x1   :  { %v18_v0 = vld [vmem:[%s2026_s0] sm:$0xff]  ;;  %v19_v2 = vld [vmem:[%s2026_s0 + $0x8] sm:$0xff]  ;;  %1387 = vrcp.f32 %v1473_v4  ;;  %v1355_v22 = vld [vmem:[%s2027_s1 + $0x2c] sm:$0xf0] }
   0x2   :  { %v39_v1 = vsel %vm38_vm0, %v18_v0, 0.0  ;;  %v42_v3 = vsel %vm38_vm0, %v19_v2, 0.0  ;;  %v1189_v21 = vld [vmem:[%s2027_s1 + $0x20] sm:$0xf]  ;;  %v1524_v24 = vld [vmem:[%s2028_s3 + $0x70] sm:$0xff]  ;;  %v1543_v32 = vld [vmem:[%s2028_s3 + $0x78] sm:$0xff] }
   0x3   :  { %40 = vadd.xlane.f32.xlu0 %v39_v1  ;;  %v1190_v23 = vor.u32 %v1355_v22, %v1189_v21  ;;  %v1185_v25 = vld [vmem:[%s2027_s1] sm:$0xf]  ;;  %v1354_v26 = vld [vmem:[%s2027_s1 + $0xc] sm:$0xf0]  ;;  %v1553_v37 = vld [vmem:[%s2028_s3 + $0x68] sm:$0xff] }
   0x4   :  { %v1186_v27 = vor.u32 %v1354_v26, %v1185_v25  ;;  %v1538_v31 = vld [vmem:[%s2028_s3 + $0x60] sm:$0xff]  ;;  %v1558_v39 = vld [vmem:[%s2028_s3 + $0x50] sm:$0xff]  ;;  %v37_v54 = vld [vmem:[%s2028_s3 + $0x88] sm:$0xff] }
   0x5   :  { %118 = vmatpush.bf16.msra.mxu0 %v1190_v23  ;;  %v36_v53 = vld [vmem:[%s2028_s3 + $0x80] sm:$0xff] }
   0x6   :  { %v1603_v4 = vld [vmem:[%s2028_s3 + $0x40] sm:$0xff] }
   0x7   :  { %v1388_v5 = vpop.eup %1387  ;;  %v1640_v25 = vld [vmem:[%s2028_s3] sm:$0xff] }
   0x8   :  { %v46_v6 = vmul.f32 32.0, %v1388_v5  ;;  %vm50_vm1 = vweird.f32 %v1388_v5 }
   0x9   :  { %119 = vmatpush.bf16.msra.mxu0 %v1186_v27 }
   0xa   :  { %v47_v7 = vsub.f32 1.0, %v46_v6 }
   0xb   :  { %43 = vadd.xlane.f32.xlu0 %v42_v3  ;;  %v1596_v3 = vld [vmem:[%s2028_s3 + $0x58] sm:$0xff] }
   0xc   :  { %v48_v8 = vmul.f32 %v1388_v5, %v47_v7 }
   0xe   :  { %v49_v9 = vadd.f32 %v1388_v5, %v48_v8 }
  0x10   :  { %v1509_v10 = vsel %vm50_vm1, %v1388_v5, %v49_v9  ;;  %v1615_v9 = vld [vmem:[%s2028_s3 + $0x48] sm:$0xff] }
  0x1f   :  { %161 = vrot.lane.b32.xlu0 %v1543_v32, %s1474_s28 }
  0x27   :  { %157 = vrot.lane.b32.xlu0 %v1553_v37, %s1474_s28 }
  0x76   :  { %v41_v11 = vpop.xlane.xlu0 %40 }
  0x77   :  { %v52_v12 = vmul.f32 %v1509_v10, %v41_v11 }
  0x79   :  { %v54_v13 = vsub.f32 %v18_v0, %v52_v12 }
  0x7b   :  { %v56_v14 = vmul.f32 %v54_v13, %v54_v13 }
  0x7d   :  { %v58_v15 = vsel %vm38_vm0, %v56_v14, 0.0 }
  0x7e   :  { %59 = vadd.xlane.f32.xlu1 %v58_v15  ;;  %v44_v16 = vpop.xlane.xlu0 %43 }
  0x7f   :  { %v53_v17 = vmul.f32 %v1509_v10, %v44_v16 }
  0x81   :  { %v55_v18 = vsub.f32 %v19_v2, %v53_v17 }
  0x83   :  { %v57_v19 = vmul.f32 %v55_v18, %v55_v18 }
  0x85   :  { %v61_v20 = vsel %vm38_vm0, %v57_v19, 0.0 }
  0x86   :  { %62 = vadd.xlane.f32.xlu1 %v61_v20 }
  0x91   :  { %v1581_v61 = vpop.permute.xlu0 %161 }
  0x9f   :  { %159 = vrot.lane.b32.xlu1 %v1524_v24, %s1474_s28 }
  0xa7   :  { %155 = vrot.lane.b32.xlu1 %v1538_v31, %s1474_s28 }
  0xaf   :  { %151 = vrot.lane.b32.xlu1 %v1558_v39, %s1474_s28 }
  0xf1   :  { %v60_v28 = vpop.xlane.xlu1 %59 }
  0xf2   :  { %v64_v29 = vmul.f32 %v60_v28, %v1509_v10 }
  0xf4   :  { %v66_v30 = vadd.f32 1e-05, %v64_v29  ;;  %v1647_v29 = vld [vmem:[%s2028_s3 + $0x8] sm:$0xff] }
  0xf6   :  { %1389 = vrsqrt.f32 %v66_v30  ;;  %vm74_vm3 = vweird.f32 %v66_v30 }
  0xf9   :  { %v63_v33 = vpop.xlane.xlu1 %62 }
  0xfa   :  { %v65_v34 = vmul.f32 %v63_v33, %v1509_v10 }
  0xfc   :  { %v1390_v35 = vpop.eup %1389  ;;  %v67_v36 = vadd.f32 1e-05, %v65_v34 }
  0xfd   :  { %v69_v38 = vmul.f32 %v1390_v35, %v66_v30  ;;  %vm75_vm2 = vweird.f32 %v1390_v35 }
  0xfe   :  { %1391 = vrsqrt.f32 %v67_v36  ;;  %vm76_vm4 = vmor %vm74_vm3, %vm75_vm2  ;;  %vm84_vm6 = vweird.f32 %v67_v36 }
  0xff   :  { %v70_v40 = vmul.f32 %v1390_v35, %v69_v38 }
 0x101   :  { %v71_v41 = vmul.f32 0.5, %v70_v40 }
 0x103   :  { %v72_v42 = vsub.f32 1.5, %v71_v41  ;;  %v1661_v41 = vld [vmem:[%s2028_s3 + $0x18] sm:$0xff] }
 0x104   :  { %v1392_v43 = vpop.eup %1391 }
 0x105   :  { %v79_v44 = vmul.f32 %v1392_v43, %v67_v36  ;;  %v73_v45 = vmul.f32 %v1390_v35, %v72_v42  ;;  %vm85_vm5 = vweird.f32 %v1392_v43 }
 0x106   :  { %vm86_vm7 = vmor %vm84_vm6, %vm85_vm5 }
 0x107   :  { %v80_v46 = vmul.f32 %v1392_v43, %v79_v44  ;;  %v77_v48 = vsel %vm76_vm4, %v1390_v35, %v73_v45  ;;  %v1654_v35 = vld [vmem:[%s2028_s3 + $0x10] sm:$0xff] }
 0x108   :  { %v88_v51 = vmul.f32 %v77_v48, %v54_v13 }
 0x109   :  { %v81_v47 = vmul.f32 0.5, %v80_v46  ;;  %v1673_v46 = vld [vmem:[%s2028_s3 + $0x28] sm:$0xff] }
 0x10a   :  { %v1570_v56 = vmul.f32 %v88_v51, %v36_v53 }
 0x10b   :  { %v82_v49 = vsub.f32 1.5, %v81_v47 }
 0x10d   :  { %v83_v50 = vmul.f32 %v1392_v43, %v82_v49 }
 0x10f   :  { %v87_v52 = vsel %vm86_vm7, %v1392_v43, %v83_v50  ;;  %v1680_v50 = vld [vmem:[%s2028_s3 + $0x30] sm:$0xff] }
 0x110   :  { %v89_v55 = vmul.f32 %v87_v52, %v55_v18 }
 0x111   :  { %v1579_v60 = vpop.permute.xlu1 %159 }
 0x112   :  { %v1572_v57 = vmul.f32 %v89_v55, %v37_v54  ;;  %v1690_v54 = vld [vmem:[%s2028_s3 + $0x38] sm:$0xff] }
 0x114   :  { %v92_v58 = vpack.c.bf16 %v1572_v57, %v1570_v56 }
 0x116   :  { %1191 = vmatmul.msk.bf16.vlgmr.msra.gmra.mxu0 %vm38_vm0, %v92_v58 }
 0x119   :  { %v1608_v7 = vpop.permute.xlu1 %155 }
 0x121   :  { %v1610_v8 = vpop.permute.xlu1 %151 }
 0x193   :  { %v1577_v59 = vpop.f32.mrf.mxu0 }
 0x194   :  { %v177_v0 = vmul.f32 %v1579_v60, %v1577_v59  ;;  %v126_v13 = vmul.f32 %v1577_v59, %v1603_v4  ;;  %v128_v16 = vmul.f32 %v1577_v59, %v1558_v39  ;;  %v130_v19 = vmul.f32 %v1577_v59, %v1538_v31 }
 0x195   :  { %v132_v22 = vmul.f32 %v1577_v59, %v1524_v24 }
 0x19b   :  { %v1583_v62 = vpop.f32.mrf.mxu0 }
 0x19c   :  { %v138_v63 = vpack.c.bf16 %v1583_v62, %v1577_v59  ;;  %v178_v1 = vmul.f32 %v1581_v61, %v1583_v62  ;;  %v127_v12 = vmul.f32 %v1583_v62, %v1615_v9  ;;  %v129_v15 = vmul.f32 %v1583_v62, %v1596_v3 }
 0x19d   :  { %v131_v18 = vmul.f32 %v1583_v62, %v1553_v37  ;;  %v133_v21 = vmul.f32 %v1583_v62, %v1543_v32 }
 0x19e   :  { %184 = vrot.lane.b32.xlu2 %v138_v63, %s1475_s15  ;;  %v182_v2 = vpack.c.bf16 %v178_v1, %v177_v0  ;;  %v134_v14 = vpack.c.bf16 %v127_v12, %v126_v13  ;;  %v135_v17 = vpack.c.bf16 %v129_v15, %v128_v16  ;;  %v1697_v0 = vld [vmem:[%s2028_s3 + $0x20] sm:$0xff] }
 0x19f   :  { %v136_v20 = vpack.c.bf16 %v131_v18, %v130_v19  ;;  %v137_v23 = vpack.c.bf16 %v133_v21, %v132_v22 }
 0x1a0   :  { %333 = vrot.lane.b32.xlu1 %v182_v2, %s1474_s28 }
 0x1a6   :  { %153 = vrot.lane.b32.xlu2 %v1596_v3, %s1474_s28 }
 0x1ae   :  { %147 = vrot.lane.b32.xlu2 %v1603_v4, %s1474_s28 }
 0x1f8   :  { %v185_v5 = vpop.permute.xlu2 %184 }
 0x1f9   :  { %v199_v6 = vsel %vm38_vm0, %v185_v5, 0 }
 0x1fa   :  { %205 = vmatpush.bf16.xpose.msra.mxu1 %v199_v6 }
 0x200   :  { %v1701_v5 = vpop.permute.xlu2 %153 }
 0x202   :  { %206 = vmatpush.bf16.xpose.msra.mxu1 %v199_v6 }
 0x208   :  { %v1708_v13 = vpop.permute.xlu2 %147 }
 0x20a   :  { %207 = vmatpush.bf16.xpose.msra.mxu1 %v199_v6 }
 0x212   :  { %208 = vmatpush.bf16.xpose.msra.mxu1 %v199_v6  ;;  %v334_v11 = vpop.permute.xlu1 %333  ;;  %v174_v6 = vmul.f32 %v1701_v5, %v1583_v62 }
 0x213   :  { %355 = vmatpush.bf16.msra.mxu2 %v334_v11  ;;  %v173_v11 = vmul.f32 %v1610_v8, %v1577_v59 }
 0x215   :  { %v180_v12 = vpack.c.bf16 %v174_v6, %v173_v11 }
 0x219   :  { %1192 = vmatmul.msk.bf16.vlgmr.msra.gmra.mxu1 %vm38_vm0, %v134_v14  ;;  %v1710_v14 = vpop.permute.xlu0 %157 }
 0x229   :  { %1193 = vmatmul.msk.bf16.gmra.mxu1 %vm38_vm0, %v135_v17 }
 0x239   :  { %1194 = vmatmul.msk.bf16.gmra.mxu1 %vm38_vm0, %v136_v20  ;;  %v171_v20 = vmul.f32 %v1708_v13, %v1577_v59 }
 0x249   :  { %1195 = vmatmul.msk.bf16.gmra.mxu1 %vm38_vm0, %v137_v23 }
 0x296   :  { %v210_v26 = vpop.f32.mrf.mxu1 }
 0x297   :  { %v211_v27 = vadd.f32 %v210_v26, %v1640_v25 }
 0x299   :  { %v231_v28 = vsel %vm230_vm8, %v211_v27, -inf }
 0x29a   :  { %232 = vmax.xlane.f32.xlu2 %v231_v28 }
 0x29e   :  { %v212_v30 = vpop.f32.mrf.mxu1 }
 0x29f   :  { %v213_v33 = vadd.f32 %v212_v30, %v1647_v29 }
 0x2a1   :  { %v234_v34 = vsel %vm230_vm8, %v213_v33, -inf }
 0x2a2   :  { %235 = vmax.xlane.f32.xlu0 %v234_v34 }
 0x2a6   :  { %v215_v36 = vpop.f32.mrf.mxu1 }
 0x2a7   :  { %v216_v38 = vadd.f32 %v215_v36, %v1654_v35 }
 0x2a9   :  { %v237_v40 = vsel %vm230_vm8, %v216_v38, -inf }
 0x2aa   :  { %238 = vmax.xlane.f32.xlu0 %v237_v40  ;;  %v176_v40 = vmul.f32 %v1710_v14, %v1583_v62 }
 0x2ae   :  { %v217_v42 = vpop.f32.mrf.mxu1 }
 0x2af   :  { %v1664_v43 = vadd.f32 %v217_v42, %v1661_v41 }
 0x2b1   :  { %v240_v44 = vsel %vm230_vm8, %v1664_v43, -inf }
 0x2b2   :  { %149 = vrot.lane.b32.xlu2 %v1615_v9, %s1474_s28  ;;  %241 = vmax.xlane.f32.xlu1 %v240_v44 }
 0x2b6   :  { %v220_v45 = vpop.f32.mrf.mxu1 }
 0x2b7   :  { %v221_v1 = vadd.f32 %v220_v45, %v1697_v0 }
 0x2b9   :  { %v243_v2 = vsel %vm230_vm8, %v221_v1, -inf }
 0x2be   :  { %v222_v47 = vpop.f32.mrf.mxu1 }
 0x2bf   :  { %v223_v48 = vadd.f32 %v222_v47, %v1673_v46 }
 0x2c1   :  { %v246_v49 = vsel %vm230_vm8, %v223_v48, -inf }
 0x2c2   :  { %247 = vmax.xlane.f32.xlu0 %v246_v49 }
 0x2c6   :  { %v225_v51 = vpop.f32.mrf.mxu1 }
 0x2c7   :  { %v1683_v52 = vadd.f32 %v225_v51, %v1680_v50 }
 0x2c9   :  { %v249_v53 = vsel %vm230_vm8, %v1683_v52, -inf }
 0x2ca   :  { %250 = vmax.xlane.f32.xlu1 %v249_v53 }
 0x2ce   :  { %v227_v55 = vpop.f32.mrf.mxu1 }
 0x2cf   :  { %v228_v58 = vadd.f32 %v227_v55, %v1690_v54 }
 0x2d1   :  { %v252_v63 = vsel %vm230_vm8, %v228_v58, -inf }
 0x2d2   :  { %253 = vmax.xlane.f32.xlu0 %v252_v63 }
 0x2db   :  { %244 = vmax.xlane.f32.xlu2 %v243_v2 }
 0x2f3   :  { %329 = vrot.lane.b32.xlu2 %v180_v12, %s1474_s28 }
 0x30d   :  { %v233_v15 = vpop.xlane.xlu2 %232 }
 0x30e   :  { %v255_v16 = vsub.f32 %v211_v27, %v233_v15 }
 0x310   :  { %v263_v17 = vmul.f32 1.442695, %v255_v16 }
 0x312   :  { %1393 = vpow2.f32 %v263_v17 }
 0x315   :  { %v1712_v18 = vpop.permute.xlu2 %149  ;;  %v236_v19 = vpop.xlane.xlu0 %235 }
 0x316   :  { %v172_v21 = vmul.f32 %v1712_v18, %v1583_v62  ;;  %v256_v22 = vsub.f32 %v213_v33, %v236_v19  ;;  %v175_v33 = vmul.f32 %v1608_v7, %v1577_v59 }
 0x318   :  { %v1718_v23 = vpop.eup %1393  ;;  %v179_v26 = vpack.c.bf16 %v172_v21, %v171_v20  ;;  %v265_v28 = vmul.f32 1.442695, %v256_v22  ;;  %v181_v44 = vpack.c.bf16 %v176_v40, %v175_v33 }
 0x319   :  { %v279_v30 = vsel %vm230_vm8, %v1718_v23, 0.0 }
 0x31a   :  { %1395 = vpow2.f32 %v265_v28  ;;  %280 = vadd.xlane.f32.xlu0 %v279_v30  ;;  %327 = vrot.lane.b32.xlu1 %v179_v26, %s1474_s28 }
 0x31d   :  { %v239_v36 = vpop.xlane.xlu0 %238 }
 0x31e   :  { %v257_v42 = vsub.f32 %v216_v38, %v239_v36 }
 0x320   :  { %v1396_v27 = vpop.eup %1395  ;;  %v267_v45 = vmul.f32 1.442695, %v257_v42 }
 0x321   :  { %v282_v34 = vsel %vm230_vm8, %v1396_v27, 0.0 }
 0x322   :  { %283 = vadd.xlane.f32.xlu0 %v282_v34  ;;  %1397 = vpow2.f32 %v267_v45 }
 0x325   :  { %v242_v59 = vpop.xlane.xlu1 %241 }
 0x326   :  { %v258_v11 = vsub.f32 %v1664_v43, %v242_v59 }
 0x328   :  { %v1398_v53 = vpop.eup %1397  ;;  %v269_v17 = vmul.f32 1.442695, %v258_v11 }
 0x329   :  { %v285_v55 = vsel %vm230_vm8, %v1398_v53, 0.0 }
 0x335   :  { %v248_v47 = vpop.xlane.xlu0 %247 }
 0x336   :  { %331 = vrot.lane.b32.xlu0 %v181_v44, %s1474_s28  ;;  %v260_v49 = vsub.f32 %v223_v48, %v248_v47 }
 0x338   :  { %v273_v51 = vmul.f32 1.442695, %v260_v49 }
 0x33a   :  { %1399 = vpow2.f32 %v273_v51 }
 0x33d   :  { %v251_v19 = vpop.xlane.xlu1 %250 }
 0x33e   :  { %v261_v20 = vsub.f32 %v1683_v52, %v251_v19 }
 0x340   :  { %v1400_v62 = vpop.eup %1399  ;;  %v275_v22 = vmul.f32 1.442695, %v261_v20 }
 0x341   :  { %v294_v38 = vsel %vm230_vm8, %v1400_v62, 0.0 }
 0x344   :  { %286 = vadd.xlane.f32.xlu1 %v285_v55 }
 0x345   :  { %v254_v63 = vpop.xlane.xlu0 %253 }
 0x346   :  { %v262_v2 = vsub.f32 %v228_v58, %v254_v63 }
 0x348   :  { %v277_v6 = vmul.f32 1.442695, %v262_v2 }
 0x34a   :  { %1401 = vpow2.f32 %v277_v6 }
 0x34c   :  { %295 = vadd.xlane.f32.xlu1 %v294_v38 }
 0x34e   :  { %v245_v12 = vpop.xlane.xlu2 %244 }
 0x34f   :  { %v259_v15 = vsub.f32 %v221_v1, %v245_v12 }
 0x350   :  { %v1732_v48 = vpop.eup %1401 }
 0x351   :  { %v271_v16 = vmul.f32 1.442695, %v259_v15  ;;  %v300_v58 = vsel %vm230_vm8, %v1732_v48, 0.0 }
 0x353   :  { %1403 = vpow2.f32 %v271_v16 }
 0x354   :  { %301 = vadd.xlane.f32.xlu1 %v300_v58  ;;  %1405 = vpow2.f32 %v269_v17 }
 0x355   :  { %1407 = vpow2.f32 %v275_v22 }
 0x356   :  { %v330_v33 = vpop.permute.xlu2 %329 }
 0x359   :  { %v1404_v21 = vpop.eup %1403 }
 0x35a   :  { %v291_v26 = vsel %vm230_vm8, %v1404_v21, 0.0  ;;  %v1406_v43 = vpop.eup %1405 }
 0x35b   :  { %292 = vadd.xlane.f32.xlu2 %v291_v26  ;;  %v288_v1 = vsel %vm230_vm8, %v1406_v43, 0.0  ;;  %v1408_v28 = vpop.eup %1407 }
 0x35c   :  { %v297_v30 = vsel %vm230_vm8, %v1408_v28, 0.0 }
 0x360   :  { %289 = vadd.xlane.f32.xlu0 %v288_v1 }
 0x368   :  { %298 = vadd.xlane.f32.xlu0 %v297_v30 }
 0x38c   :  { %v328_v45 = vpop.permute.xlu1 %327 }
 0x38d   :  { %v281_v34 = vpop.xlane.xlu0 %280 }
 0x395   :  { %v284_v36 = vpop.xlane.xlu0 %283 }
 0x396   :  { %1409 = vrcp.f32 %v284_v36 }
 0x397   :  { %1411 = vrcp.f32 %v281_v34 }
 0x39c   :  { %v1410_v52 = vpop.eup %1409 }
 0x39d   :  { %v1412_v42 = vpop.eup %1411  ;;  %v312_v44 = vmul.f32 %v1410_v52, %v1396_v27 }
 0x39e   :  { %v311_v47 = vmul.f32 %v1412_v42, %v1718_v23 }
 0x3a0   :  { %v319_v49 = vpack.c.bf16 %v312_v44, %v311_v47 }
 0x3a8   :  { %v332_v40 = vpop.permute.xlu0 %331 }
 0x3a9   :  { %356 = vmatpush.bf16.msra.mxu2 %v332_v40 }
 0x3ad   :  { %357 = vmatpush.bf16.msra.mxu2 %v330_v33 }
 0x3b1   :  { %358 = vmatpush.bf16.msra.mxu2 %v328_v45 }
 0x3b4   :  { %1196 = vmatmul.msk.bf16.vlgmr.msra.gmra.mxu2 %vm230_vm8, %v319_v49 }
 0x3b7   :  { %v287_v51 = vpop.xlane.xlu1 %286 }
 0x3b8   :  { %1413 = vrcp.f32 %v287_v51 }
 0x3be   :  { %v1414_v63 = vpop.eup %1413 }
 0x3bf   :  { %v313_v6 = vmul.f32 %v1414_v63, %v1398_v53  ;;  %v296_v12 = vpop.xlane.xlu1 %295 }
 0x3c7   :  { %v302_v58 = vpop.xlane.xlu1 %301 }
 0x3ce   :  { %v293_v38 = vpop.xlane.xlu2 %292 }
 0x3d3   :  { %v290_v55 = vpop.xlane.xlu0 %289 }
 0x3d4   :  { %1415 = vrcp.f32 %v290_v55 }
 0x3d5   :  { %1417 = vrcp.f32 %v293_v38 }
 0x3d6   :  { %1419 = vrcp.f32 %v296_v12 }
 0x3da   :  { %v1416_v2 = vpop.eup %1415 }
 0x3db   :  { %v314_v59 = vmul.f32 %v1416_v2, %v1406_v43  ;;  %v1418_v23 = vpop.eup %1417  ;;  %v299_v17 = vpop.xlane.xlu0 %298 }
 0x3dc   :  { %v1420_v27 = vpop.eup %1419  ;;  %v315_v15 = vmul.f32 %v1418_v23, %v1404_v21  ;;  %1421 = vrcp.f32 %v299_v17  ;;  %v1357_v21 = vld [vmem:[%s2027_s1 + $0x34] sm:$0xf0] }
 0x3dd   :  { %v320_v11 = vpack.c.bf16 %v314_v59, %v313_v6  ;;  %v316_v16 = vmul.f32 %v1420_v27, %v1400_v62  ;;  %1423 = vrcp.f32 %v302_v58  ;;  %v1206_v62 = vld [vmem:[%s2027_s1 + $0x28] sm:$0xf] }
 0x3de   :  { %v1207_v36 = vor.u32 %v1357_v21, %v1206_v62 }
 0x3df   :  { %1197 = vmatmul.msk.bf16.gmra.mxu2 %vm230_vm8, %v320_v11  ;;  %v321_v19 = vpack.c.bf16 %v316_v16, %v315_v15 }
 0x3e0   :  { %412 = vmatpush.bf16.msra.mxu3 %v1207_v36 }
 0x3e2   :  { %v1422_v53 = vpop.eup %1421 }
 0x3e3   :  { %v1424_v20 = vpop.eup %1423  ;;  %v317_v22 = vmul.f32 %v1422_v53, %v1408_v28  ;;  %v1356_v28 = vld [vmem:[%s2027_s1 + $0x14] sm:$0xf0] }
 0x3e4   :  { %v318_v26 = vmul.f32 %v1424_v20, %v1732_v48  ;;  %v1202_v48 = vld [vmem:[%s2027_s1 + $0x8] sm:$0xf] }
 0x3e5   :  { %v1203_v52 = vor.u32 %v1356_v28, %v1202_v48  ;;  %v1367_v48 = vld [vmem:[%s2029_s2 + $0x38] sm:$0xff]  ;;  %v1366_v28 = vld [vmem:[%s2029_s2 + $0x30] sm:$0xff] }
 0x3e6   :  { %v322_v43 = vpack.c.bf16 %v318_v26, %v317_v22 }
 0x3e7   :  { %413 = vmatpush.bf16.msra.mxu3 %v1203_v52 }
 0x3eb   :  { %571 = vmatpush.bf16.msrb.mxu3 %v1367_v48 }
 0x3ef   :  { %1198 = vmatmul.msk.bf16.gmra.mxu2 %vm230_vm8, %v321_v19  ;;  %572 = vmatpush.bf16.msrb.mxu3 %v1366_v28 }
 0x3ff   :  { %1199 = vmatmul.msk.bf16.gmra.mxu2 %vm230_vm8, %v322_v43  ;;  %v1359_v43 = vld [vmem:[%s2027_s1 + $0x30] sm:$0xf0] }
 0x437   :  { %v360_v1 = vpop.f32.mrf.mxu2 }
 0x43f   :  { %v362_v30 = vpop.f32.mrf.mxu2 }
 0x462   :  { %v365_v34 = vpop.f32.mrf.mxu2 }
 0x463   :  { %v380_v45 = vadd.f32 %v365_v34, %v360_v1  ;;  %v1358_v34 = vld [vmem:[%s2027_s1 + $0x10] sm:$0xf0] }
 0x46a   :  { %v367_v40 = vpop.f32.mrf.mxu2 }
 0x46b   :  { %v381_v47 = vadd.f32 %v367_v40, %v362_v30  ;;  %v1211_v30 = vld [vmem:[%s2027_s1 + $0x4] sm:$0xf] }
 0x46c   :  { %v1212_v21 = vor.u32 %v1358_v34, %v1211_v30 }
 0x472   :  { %v370_v33 = vpop.f32.mrf.mxu2 }
 0x473   :  { %v382_v49 = vadd.f32 %v380_v45, %v370_v33  ;;  %v1365_v45 = vld [vmem:[%s2029_s2 + $0x28] sm:$0xff] }
 0x474   :  { %573 = vmatpush.bf16.msrb.mxu3 %v1365_v45 }
 0x47a   :  { %v372_v42 = vpop.f32.mrf.mxu2 }
 0x47b   :  { %v383_v51 = vadd.f32 %v381_v47, %v372_v42 }
 0x482   :  { %v375_v44 = vpop.f32.mrf.mxu2 }
 0x483   :  { %v384_v63 = vadd.f32 %v382_v49, %v375_v44 }
 0x48a   :  { %v377_v55 = vpop.f32.mrf.mxu2 }
 0x48b   :  { %v385_v2 = vadd.f32 %v383_v51, %v377_v55  ;;  %v1364_v51 = vld [vmem:[%s2029_s2 + $0x20] sm:$0xff] }
 0x48c   :  { %574 = vmatpush.bf16.msrb.mxu3 %v1364_v51 }
 0x48d   :  { %v386_v6 = vpack.c.bf16 %v385_v2, %v384_v63 }
 0x48f   :  { %1208 = vmatmul.msk.bf16.vlgmr.msra.gmra.mxu3 %vm38_vm0, %v386_v6  ;;  %v1363_v6 = vld [vmem:[%s2029_s2 + $0x18] sm:$0xff] }
 0x490   :  { %575 = vmatpush.bf16.msrb.mxu3 %v1363_v6 }
 0x512   :  { %v415_v59 = vpop.f32.mrf.mxu3 }
 0x513   :  { %v420_v38 = vadd.f32 %v415_v59, %v1570_v56 }
 0x515   :  { %v424_v11 = vsel %vm38_vm0, %v420_v38, 0.0 }
 0x516   :  { %425 = vadd.xlane.f32.xlu2 %v424_v11 }
 0x51a   :  { %v417_v12 = vpop.f32.mrf.mxu3 }
 0x51b   :  { %v421_v23 = vadd.f32 %v417_v12, %v1572_v57  ;;  %v1215_v57 = vld [vmem:[%s2027_s1 + $0x24] sm:$0xf] }
 0x51c   :  { %v1216_v1 = vor.u32 %v1359_v43, %v1215_v57  ;;  %v1361_v43 = vld [vmem:[%s2029_s2 + $0x8] sm:$0xff] }
 0x51d   :  { %v427_v27 = vsel %vm38_vm0, %v421_v23, 0.0 }
 0x51e   :  { %428 = vadd.xlane.f32.xlu0 %v427_v27  ;;  %496 = vmatpush.bf16.msrb.mxu0 %v1216_v1  ;;  %v1360_v1 = vld [vmem:[%s2029_s2] sm:$0xff] }
 0x522   :  { %497 = vmatpush.bf16.msrb.mxu0 %v1212_v21 }
 0x589   :  { %v426_v15 = vpop.xlane.xlu2 %425 }
 0x58a   :  { %v430_v16 = vmul.f32 %v426_v15, %v1509_v10 }
 0x58c   :  { %v432_v17 = vsub.f32 %v420_v38, %v430_v16 }
 0x58e   :  { %v434_v19 = vmul.f32 %v432_v17, %v432_v17 }
 0x590   :  { %v436_v58 = vsel %vm38_vm0, %v434_v19, 0.0 }
 0x591   :  { %437 = vadd.xlane.f32.xlu1 %v436_v58  ;;  %v429_v53 = vpop.xlane.xlu0 %428  ;;  %v422_v58 = vld [vmem:[%s2028_s3 + $0x90] sm:$0xff] }
 0x592   :  { %v431_v56 = vmul.f32 %v429_v53, %v1509_v10  ;;  %v423_v53 = vld [vmem:[%s2028_s3 + $0x98] sm:$0xff] }
 0x594   :  { %v433_v20 = vsub.f32 %v421_v23, %v431_v56 }
 0x596   :  { %v435_v22 = vmul.f32 %v433_v20, %v433_v20 }
 0x598   :  { %v439_v26 = vsel %vm38_vm0, %v435_v22, 0.0 }
 0x599   :  { %440 = vadd.xlane.f32.xlu2 %v439_v26 }
 0x604   :  { %v438_v62 = vpop.xlane.xlu1 %437 }
 0x605   :  { %v442_v36 = vmul.f32 %v438_v62, %v1509_v10 }
 0x607   :  { %v444_v40 = vadd.f32 1e-05, %v442_v36 }
 0x609   :  { %1425 = vrsqrt.f32 %v444_v40  ;;  %vm452_vm10 = vweird.f32 %v444_v40 }
 0x60c   :  { %v441_v52 = vpop.xlane.xlu2 %440 }
 0x60d   :  { %v443_v33 = vmul.f32 %v441_v52, %v1509_v10 }
 0x60f   :  { %v1426_v42 = vpop.eup %1425  ;;  %v445_v44 = vadd.f32 1e-05, %v443_v33 }
 0x610   :  { %v447_v47 = vmul.f32 %v1426_v42, %v444_v40  ;;  %vm453_vm9 = vweird.f32 %v1426_v42 }
 0x611   :  { %1427 = vrsqrt.f32 %v445_v44  ;;  %vm454_vm11 = vmor %vm452_vm10, %vm453_vm9  ;;  %vm462_vm13 = vweird.f32 %v445_v44 }
 0x612   :  { %v448_v49 = vmul.f32 %v1426_v42, %v447_v47 }
 0x614   :  { %v449_v55 = vmul.f32 0.5, %v448_v49 }
 0x616   :  { %v450_v63 = vsub.f32 1.5, %v449_v55 }
 0x617   :  { %v1428_v2 = vpop.eup %1427 }
 0x618   :  { %v457_v59 = vmul.f32 %v1428_v2, %v445_v44  ;;  %v451_v38 = vmul.f32 %v1426_v42, %v450_v63  ;;  %vm463_vm12 = vweird.f32 %v1428_v2 }
 0x619   :  { %vm464_vm14 = vmor %vm462_vm13, %vm463_vm12 }
 0x61a   :  { %v458_v11 = vmul.f32 %v1428_v2, %v457_v59  ;;  %v455_v23 = vsel %vm454_vm11, %v1426_v42, %v451_v38  ;;  %v1260_v59 = vld [vmem:[%s2027_s1 + $0x60] sm:$0xf]  ;;  %v1369_v38 = vld [vmem:[%s2027_s1 + $0x6c] sm:$0xf0] }
 0x61b   :  { %v466_v16 = vmul.f32 %v455_v23, %v432_v17  ;;  %v1362_v17 = vld [vmem:[%s2029_s2 + $0x10] sm:$0xff]  ;;  %v1256_v23 = vld [vmem:[%s2027_s1 + $0x40] sm:$0xf] }
 0x61c   :  { %v459_v12 = vmul.f32 0.5, %v458_v11  ;;  %576 = vmatpush.bf16.msrb.mxu3 %v1362_v17  ;;  %v1261_v11 = vor.u32 %v1369_v38, %v1260_v59 }
 0x61d   :  { %v468_v22 = vmul.f32 %v466_v16, %v422_v58 }
 0x61e   :  { %v460_v27 = vsub.f32 1.5, %v459_v12  ;;  %662 = vmatpush.bf16.msra.mxu0 %v1261_v11 }
 0x620   :  { %v461_v15 = vmul.f32 %v1428_v2, %v460_v27  ;;  %577 = vmatpush.bf16.msrb.mxu3 %v1361_v43  ;;  %v1368_v27 = vld [vmem:[%s2027_s1 + $0x4c] sm:$0xf0] }
 0x621   :  { %v1257_v16 = vor.u32 %v1368_v27, %v1256_v23 }
 0x622   :  { %v465_v19 = vsel %vm464_vm14, %v1428_v2, %v461_v15 }
 0x623   :  { %v467_v56 = vmul.f32 %v465_v19, %v433_v20  ;;  %663 = vmatpush.bf16.msra.mxu0 %v1257_v16 }
 0x624   :  { %578 = vmatpush.bf16.msrb.mxu3 %v1360_v1 }
 0x625   :  { %v469_v26 = vmul.f32 %v467_v56, %v423_v53 }
 0x627   :  { %v470_v57 = vpack.c.bf16 %v469_v26, %v468_v22 }
 0x629   :  { %1217 = vmatmul.msk.bf16.vlgmr.msrb.gmra.mxu0 %vm38_vm0, %v470_v57 }
 0x6a6   :  { %v499_v20 = vpop.f32.mrf.mxu0 }
 0x6a7   :  { %v504_v34 = vmax.f32 %v499_v20, 0.0 }
 0x6ae   :  { %v501_v30 = vpop.f32.mrf.mxu0 }
 0x6af   :  { %v505_v62 = vmax.f32 %v501_v30, 0.0 }
 0x6b1   :  { %v506_v21 = vpack.c.bf16 %v505_v62, %v504_v34 }
 0x6b3   :  { %579 = vmatmul.bf16.vlgmr.msrb.gmra.mxu3 %v506_v21 }
 0x736   :  { %v580_v36 = vpop.f32.mrf.mxu3 }
 0x737   :  { %v585_v40 = vadd.f32 %v580_v36, %v468_v22 }
 0x739   :  { %v589_v48 = vsel %vm38_vm0, %v585_v40, 0.0 }
 0x73a   :  { %590 = vadd.xlane.f32.xlu0 %v589_v48 }
 0x73e   :  { %v582_v28 = vpop.f32.mrf.mxu3 }
 0x73f   :  { %v586_v52 = vadd.f32 %v582_v28, %v469_v26  ;;  %v587_v28 = vld [vmem:[%s2028_s3 + $0xa0] sm:$0xff] }
 0x741   :  { %v592_v33 = vsel %vm38_vm0, %v586_v52, 0.0 }
 0x742   :  { %593 = vadd.xlane.f32.xlu1 %v592_v33 }
 0x7ad   :  { %v591_v42 = vpop.xlane.xlu0 %590 }
 0x7ae   :  { %v595_v44 = vmul.f32 %v591_v42, %v1509_v10 }
 0x7b0   :  { %v597_v45 = vsub.f32 %v585_v40, %v595_v44 }
 0x7b2   :  { %v599_v47 = vmul.f32 %v597_v45, %v597_v45 }
 0x7b4   :  { %v601_v49 = vsel %vm38_vm0, %v599_v47, 0.0 }
 0x7b5   :  { %602 = vadd.xlane.f32.xlu2 %v601_v49  ;;  %v594_v51 = vpop.xlane.xlu1 %593 }
 0x7b6   :  { %v596_v55 = vmul.f32 %v594_v51, %v1509_v10 }
 0x7b8   :  { %v598_v63 = vsub.f32 %v586_v52, %v596_v55  ;;  %v588_v52 = vld [vmem:[%s2028_s3 + $0xa8] sm:$0xff] }
 0x7ba   :  { %v600_v2 = vmul.f32 %v598_v63, %v598_v63 }
 0x7bc   :  { %v604_v6 = vsel %vm38_vm0, %v600_v2, 0.0 }
 0x7bd   :  { %605 = vadd.xlane.f32.xlu0 %v604_v6 }
 0x828   :  { %v603_v12 = vpop.xlane.xlu2 %602 }
 0x829   :  { %v607_v15 = vmul.f32 %v603_v12, %v1509_v10 }
 0x82b   :  { %v609_v19 = vadd.f32 1e-05, %v607_v15 }
 0x82d   :  { %1429 = vrsqrt.f32 %v609_v19  ;;  %vm617_vm1 = vweird.f32 %v609_v19 }
 0x830   :  { %v606_v58 = vpop.xlane.xlu0 %605 }
 0x831   :  { %v608_v53 = vmul.f32 %v606_v58, %v1509_v10 }
 0x833   :  { %v1430_v56 = vpop.eup %1429  ;;  %v610_v22 = vadd.f32 1e-05, %v608_v53 }
 0x834   :  { %v612_v26 = vmul.f32 %v1430_v56, %v609_v19  ;;  %vm618_vm15 = vweird.f32 %v1430_v56 }
 0x835   :  { %1431 = vrsqrt.f32 %v610_v22  ;;  %vm619_vm2 = vmor %vm617_vm1, %vm618_vm15  ;;  %vm627_vm4 = vweird.f32 %v610_v22 }
 0x836   :  { %v613_v57 = vmul.f32 %v1430_v56, %v612_v26 }
 0x838   :  { %v614_v17 = vmul.f32 0.5, %v613_v57 }
 0x83a   :  { %v615_v43 = vsub.f32 1.5, %v614_v17 }
 0x83b   :  { %v1432_v1 = vpop.eup %1431 }
 0x83c   :  { %v622_v20 = vmul.f32 %v1432_v1, %v610_v22  ;;  %v616_v30 = vmul.f32 %v1430_v56, %v615_v43  ;;  %vm628_vm3 = vweird.f32 %v1432_v1 }
 0x83d   :  { %vm629_vm5 = vmor %vm627_vm4, %vm628_vm3 }
 0x83e   :  { %v623_v34 = vmul.f32 %v1432_v1, %v622_v20  ;;  %v620_v21 = vsel %vm619_vm2, %v1430_v56, %v616_v30 }
 0x83f   :  { %v631_v48 = vmul.f32 %v620_v21, %v597_v45 }
 0x840   :  { %v624_v62 = vmul.f32 0.5, %v623_v34 }
 0x841   :  { %v1838_v44 = vmul.f32 %v631_v48, %v587_v28 }
 0x842   :  { %v625_v36 = vsub.f32 1.5, %v624_v62 }
 0x844   :  { %v626_v40 = vmul.f32 %v1432_v1, %v625_v36 }
 0x846   :  { %v630_v33 = vsel %vm629_vm5, %v1432_v1, %v626_v40 }
 0x847   :  { %v632_v42 = vmul.f32 %v630_v33, %v598_v63 }
 0x849   :  { %v1840_v47 = vmul.f32 %v632_v42, %v588_v52 }
 0x84b   :  { %v635_v49 = vpack.c.bf16 %v1840_v47, %v1838_v44 }
 0x84d   :  { %1262 = vmatmul.msk.bf16.vlgmr.msra.gmra.mxu0 %vm38_vm0, %v635_v49 }
 0x8ca   :  { %v1845_v45 = vpop.f32.mrf.mxu0 }
 0x8cb   :  { %v670_v59 = vmul.f32 %v1845_v45, %v1603_v4  ;;  %v672_v12 = vmul.f32 %v1845_v45, %v1558_v39  ;;  %v687_v40 = vmul.f32 %v1845_v45, %v1608_v7 }
 0x8d2   :  { %v1847_v51 = vpop.f32.mrf.mxu0 }
 0x8d3   :  { %v682_v55 = vpack.c.bf16 %v1847_v51, %v1845_v45  ;;  %v671_v6 = vmul.f32 %v1847_v51, %v1615_v9  ;;  %v673_v11 = vmul.f32 %v1847_v51, %v1596_v3  ;;  %v675_v27 = vmul.f32 %v1847_v51, %v1553_v37 }
 0x8d4   :  { %v674_v9 = vmul.f32 %v1845_v45, %v1538_v31  ;;  %v677_v4 = vmul.f32 %v1847_v51, %v1543_v32  ;;  %v676_v3 = vmul.f32 %v1845_v45, %v1524_v24  ;;  %v690_v62 = vmul.f32 %v1847_v51, %v1581_v61 }
 0x8d5   :  { %696 = vrot.lane.b32.xlu1 %v682_v55, %s1475_s15  ;;  %v678_v38 = vpack.c.bf16 %v671_v6, %v670_v59  ;;  %v679_v23 = vpack.c.bf16 %v673_v11, %v672_v12  ;;  %v684_v61 = vmul.f32 %v1847_v51, %v1712_v18 }
 0x8d6   :  { %v680_v15 = vpack.c.bf16 %v675_v27, %v674_v9  ;;  %v681_v16 = vpack.c.bf16 %v677_v4, %v676_v3 }
 0x947   :  { %v697_v2 = vpop.permute.xlu1 %696 }
 0x948   :  { %v711_v63 = vsel %vm38_vm0, %v697_v2, 0 }
 0x949   :  { %717 = vmatpush.bf16.xpose.msrb.mxu0 %v711_v63 }
 0x951   :  { %718 = vmatpush.bf16.xpose.msrb.mxu0 %v711_v63 }
 0x959   :  { %719 = vmatpush.bf16.xpose.msrb.mxu0 %v711_v63 }
 0x961   :  { %720 = vmatpush.bf16.xpose.msrb.mxu0 %v711_v63 }
 0x968   :  { %1263 = vmatmul.msk.bf16.vlgmr.msrb.gmra.mxu0 %vm38_vm0, %v678_v38 }
 0x978   :  { %1264 = vmatmul.msk.bf16.gmra.mxu0 %vm38_vm0, %v679_v23 }
 0x988   :  { %1265 = vmatmul.msk.bf16.gmra.mxu0 %vm38_vm0, %v680_v15 }
 0x998   :  { %1266 = vmatmul.msk.bf16.gmra.mxu0 %vm38_vm0, %v681_v16  ;;  %v686_v16 = vmul.f32 %v1847_v51, %v1701_v5 }
 0x9e5   :  { %v722_v39 = vpop.f32.mrf.mxu0 }
 0x9e6   :  { %v723_v19 = vadd.f32 %v722_v39, %v1640_v25  ;;  %v685_v39 = vmul.f32 %v1845_v45, %v1610_v8 }
 0x9e8   :  { %v742_v37 = vsel %vm230_vm8, %v723_v19, -inf }
 0x9e9   :  { %743 = vmax.xlane.f32.xlu2 %v742_v37  ;;  %v692_v37 = vpack.c.bf16 %v686_v16, %v685_v39 }
 0x9ed   :  { %v724_v58 = vpop.f32.mrf.mxu0 }
 0x9ee   :  { %v725_v31 = vadd.f32 %v724_v58, %v1647_v29 }
 0x9f0   :  { %v745_v53 = vsel %vm230_vm8, %v725_v31, -inf }
 0x9f1   :  { %746 = vmax.xlane.f32.xlu0 %v745_v53 }
 0x9f5   :  { %v727_v56 = vpop.f32.mrf.mxu0 }
 0x9f6   :  { %v728_v32 = vadd.f32 %v727_v56, %v1654_v35 }
 0x9f8   :  { %v748_v24 = vsel %vm230_vm8, %v728_v32, -inf }
 0x9f9   :  { %749 = vmax.xlane.f32.xlu2 %v748_v24 }
 0x9fd   :  { %v729_v22 = vpop.f32.mrf.mxu0 }
 0x9fe   :  { %v730_v26 = vadd.f32 %v729_v22, %v1661_v41 }
 0xa00   :  { %v751_v25 = vsel %vm230_vm8, %v730_v26, -inf }
 0xa01   :  { %752 = vmax.xlane.f32.xlu0 %v751_v25 }
 0xa05   :  { %v732_v57 = vpop.f32.mrf.mxu0 }
 0xa06   :  { %v733_v17 = vadd.f32 %v732_v57, %v1697_v0 }
 0xa08   :  { %v754_v29 = vsel %vm230_vm8, %v733_v17, -inf }
 0xa09   :  { %755 = vmax.xlane.f32.xlu2 %v754_v29 }
 0xa0d   :  { %v734_v43 = vpop.f32.mrf.mxu0 }
 0xa0e   :  { %v1884_v1 = vadd.f32 %v734_v43, %v1673_v46  ;;  %v689_v46 = vmul.f32 %v1845_v45, %v1579_v60 }
 0xa10   :  { %v757_v35 = vsel %vm230_vm8, %v1884_v1, -inf  ;;  %v694_v36 = vpack.c.bf16 %v690_v62, %v689_v46 }
 0xa11   :  { %758 = vmax.xlane.f32.xlu0 %v757_v35 }
 0xa15   :  { %v737_v20 = vpop.f32.mrf.mxu0 }
 0xa16   :  { %v738_v41 = vadd.f32 %v737_v20, %v1680_v50  ;;  %v688_v50 = vmul.f32 %v1847_v51, %v1710_v14 }
 0xa18   :  { %v760_v30 = vsel %vm230_vm8, %v738_v41, -inf  ;;  %v693_v48 = vpack.c.bf16 %v688_v50, %v687_v40 }
 0xa19   :  { %761 = vmax.xlane.f32.xlu1 %v760_v30 }
 0xa1d   :  { %v739_v34 = vpop.f32.mrf.mxu0 }
 0xa1e   :  { %v740_v0 = vadd.f32 %v739_v34, %v1690_v54  ;;  %v683_v54 = vmul.f32 %v1845_v45, %v1708_v13 }
 0xa20   :  { %v763_v21 = vsel %vm230_vm8, %v740_v0, -inf  ;;  %v691_v28 = vpack.c.bf16 %v684_v61, %v683_v54 }
 0xa21   :  { %764 = vmax.xlane.f32.xlu2 %v763_v21 }
 0xa25   :  { %844 = vrot.lane.b32.xlu0 %v694_v36, %s1474_s28 }
 0xa2d   :  { %842 = vrot.lane.b32.xlu0 %v693_v48, %s1474_s28 }
 0xa35   :  { %838 = vrot.lane.b32.xlu0 %v691_v28, %s1474_s28 }
 0xa5c   :  { %v744_v60 = vpop.xlane.xlu2 %743 }
 0xa5d   :  { %v766_v52 = vsub.f32 %v723_v19, %v744_v60 }
 0xa5f   :  { %v774_v33 = vmul.f32 1.442695, %v766_v52 }
 0xa61   :  { %1433 = vpow2.f32 %v774_v33 }
 0xa64   :  { %v747_v14 = vpop.xlane.xlu0 %746 }
 0xa65   :  { %v767_v42 = vsub.f32 %v725_v31, %v747_v14 }
 0xa67   :  { %v1907_v49 = vpop.eup %1433  ;;  %v776_v7 = vmul.f32 1.442695, %v767_v42 }
 0xa68   :  { %v790_v55 = vsel %vm230_vm8, %v1907_v49, 0.0 }
 0xa69   :  { %1435 = vpow2.f32 %v776_v7  ;;  %791 = vadd.xlane.f32.xlu2 %v790_v55 }
 0xa6c   :  { %v750_v18 = vpop.xlane.xlu2 %749 }
 0xa6d   :  { %v768_v2 = vsub.f32 %v728_v32, %v750_v18 }
 0xa6f   :  { %v1436_v13 = vpop.eup %1435  ;;  %v778_v63 = vmul.f32 1.442695, %v768_v2 }
 0xa70   :  { %v793_v6 = vsel %vm230_vm8, %v1436_v13, 0.0 }
 0xa71   :  { %1437 = vpow2.f32 %v778_v63  ;;  %794 = vadd.xlane.f32.xlu2 %v793_v6 }
 0xa74   :  { %v753_v59 = vpop.xlane.xlu0 %752 }
 0xa75   :  { %v769_v38 = vsub.f32 %v730_v26, %v753_v59 }
 0xa77   :  { %v1912_v11 = vpop.eup %1437  ;;  %v780_v12 = vmul.f32 1.442695, %v769_v38  ;;  %v1281_v38 = vld [vmem:[%s2027_s1 + $0x68] sm:$0xf] }
 0xa78   :  { %v796_v23 = vsel %vm230_vm8, %v1912_v11, 0.0 }
 0xa79   :  { %1439 = vpow2.f32 %v780_v12  ;;  %797 = vadd.xlane.f32.xlu0 %v796_v23  ;;  %v1277_v12 = vld [vmem:[%s2027_s1 + $0x48] sm:$0xf] }
 0xa7c   :  { %v756_v27 = vpop.xlane.xlu2 %755 }
 0xa7d   :  { %v770_v9 = vsub.f32 %v733_v17, %v756_v27  ;;  %v1370_v27 = vld [vmem:[%s2027_s1 + $0x54] sm:$0xf0] }
 0xa7f   :  { %v1440_v15 = vpop.eup %1439  ;;  %v782_v4 = vmul.f32 1.442695, %v770_v9  ;;  %v1278_v9 = vor.u32 %v1370_v27, %v1277_v12 }
 0xa80   :  { %v799_v3 = vsel %vm230_vm8, %v1440_v15, 0.0 }
 0xa81   :  { %1441 = vpow2.f32 %v782_v4  ;;  %800 = vadd.xlane.f32.xlu1 %v799_v3 }
 0xa84   :  { %v759_v56 = vpop.xlane.xlu0 %758 }
 0xa85   :  { %v771_v57 = vsub.f32 %v1884_v1, %v759_v56 }
 0xa87   :  { %v1442_v19 = vpop.eup %1441  ;;  %v784_v29 = vmul.f32 1.442695, %v771_v57 }
 0xa88   :  { %v802_v58 = vsel %vm230_vm8, %v1442_v19, 0.0 }
 0xa89   :  { %840 = vrot.lane.b32.xlu2 %v692_v37, %s1474_s28  ;;  %803 = vadd.xlane.f32.xlu1 %v802_v58 }
 0xa8c   :  { %v762_v31 = vpop.xlane.xlu1 %761 }
 0xa8d   :  { %v772_v53 = vsub.f32 %v738_v41, %v762_v31 }
 0xa8f   :  { %v786_v32 = vmul.f32 1.442695, %v772_v53 }
 0xa91   :  { %1443 = vpow2.f32 %v786_v32 }
 0xa94   :  { %v765_v24 = vpop.xlane.xlu2 %764 }
 0xa95   :  { %v773_v22 = vsub.f32 %v740_v0, %v765_v24 }
 0xa97   :  { %v1444_v26 = vpop.eup %1443  ;;  %v788_v25 = vmul.f32 1.442695, %v773_v22  ;;  %v845_v5 = vpop.permute.xlu0 %844 }
 0xa98   :  { %866 = vmatpush.bf16.msra.mxu3 %v845_v5  ;;  %v808_v8 = vsel %vm230_vm8, %v1444_v26, 0.0 }
 0xa99   :  { %1445 = vpow2.f32 %v788_v25  ;;  %809 = vadd.xlane.f32.xlu1 %v808_v8 }
 0xa9a   :  { %1447 = vpow2.f32 %v784_v29  ;;  %v1373_v29 = vld [vmem:[%s2027_s1 + $0x70] sm:$0xf0] }
 0xa9f   :  { %v1446_v45 = vpop.eup %1445  ;;  %v843_v51 = vpop.permute.xlu0 %842 }
 0xaa0   :  { %867 = vmatpush.bf16.msra.mxu3 %v843_v51  ;;  %v811_v17 = vsel %vm230_vm8, %v1446_v45, 0.0  ;;  %v1448_v43 = vpop.eup %1447 }
 0xaa1   :  { %812 = vadd.xlane.f32.xlu1 %v811_v17  ;;  %v805_v35 = vsel %vm230_vm8, %v1448_v43, 0.0  ;;  %v1294_v17 = vld [vmem:[%s2027_s1 + $0x64] sm:$0xf] }
 0xaa7   :  { %v839_v34 = vpop.permute.xlu0 %838 }
 0xab2   :  { %806 = vadd.xlane.f32.xlu2 %v805_v35 }
 0xadc   :  { %v792_v20 = vpop.xlane.xlu2 %791 }
 0xae4   :  { %v795_v41 = vpop.xlane.xlu2 %794 }
 0xae5   :  { %1449 = vrcp.f32 %v795_v41 }
 0xae6   :  { %1451 = vrcp.f32 %v792_v20 }
 0xaeb   :  { %v1450_v30 = vpop.eup %1449 }
 0xaec   :  { %v841_v0 = vpop.permute.xlu2 %840  ;;  %v1452_v62 = vpop.eup %1451  ;;  %v823_v1 = vmul.f32 %v1450_v30, %v1436_v13 }
 0xaed   :  { %868 = vmatpush.bf16.msra.mxu3 %v841_v0  ;;  %v822_v21 = vmul.f32 %v1452_v62, %v1907_v49  ;;  %v798_v36 = vpop.xlane.xlu0 %797 }
 0xaef   :  { %v830_v46 = vpack.c.bf16 %v823_v1, %v822_v21  ;;  %v1290_v21 = vld [vmem:[%s2027_s1 + $0x44] sm:$0xf] }
 0xaf1   :  { %869 = vmatpush.bf16.msra.mxu3 %v839_v34 }
 0xaf4   :  { %v801_v50 = vpop.xlane.xlu1 %800  ;;  %1267 = vmatmul.msk.bf16.vlgmr.msra.gmra.mxu3 %vm230_vm8, %v830_v46  ;;  %v1372_v46 = vld [vmem:[%s2027_s1 + $0x50] sm:$0xf0] }
 0xaf5   :  { %1453 = vrcp.f32 %v801_v50 }
 0xaf6   :  { %1455 = vrcp.f32 %v798_v36  ;;  %v1291_v36 = vor.u32 %v1372_v46, %v1290_v21  ;;  %v1382_v21 = vld [vmem:[%s2027_s1 + $0x18] sm:$0xf0] }
 0xafb   :  { %v1454_v40 = vpop.eup %1453 }
 0xafc   :  { %v1456_v48 = vpop.eup %1455  ;;  %v825_v61 = vmul.f32 %v1454_v40, %v1440_v15  ;;  %v804_v60 = vpop.xlane.xlu1 %803 }
 0xafd   :  { %v824_v54 = vmul.f32 %v1456_v48, %v1912_v11  ;;  %1457 = vrcp.f32 %v804_v60  ;;  %v1371_v11 = vld [vmem:[%s2027_s1 + $0x74] sm:$0xf0] }
 0xafe   :  { %v1282_v23 = vor.u32 %v1371_v11, %v1281_v38 }
 0xaff   :  { %v831_v28 = vpack.c.bf16 %v825_v61, %v824_v54  ;;  %v1381_v61 = vld [vmem:[%s2029_s2 + $0x78] sm:$0xff]  ;;  %v1380_v54 = vld [vmem:[%s2029_s2 + $0x70] sm:$0xff] }
 0xb00   :  { %923 = vmatpush.bf16.msrb.mxu2 %v1282_v23 }
 0xb03   :  { %v1458_v14 = vpop.eup %1457 }
 0xb04   :  { %1268 = vmatmul.msk.bf16.gmra.mxu3 %vm230_vm8, %v831_v28  ;;  %v826_v49 = vmul.f32 %v1458_v14, %v1442_v19  ;;  %924 = vmatpush.bf16.msrb.mxu2 %v1278_v9  ;;  %v1379_v14 = vld [vmem:[%s2029_s2 + $0x68] sm:$0xff] }
 0xb08   :  { %1083 = vmatpush.bf16.msra.mxu2 %v1381_v61 }
 0xb0c   :  { %v810_v52 = vpop.xlane.xlu1 %809  ;;  %1084 = vmatpush.bf16.msra.mxu2 %v1380_v54 }
 0xb10   :  { %1085 = vmatpush.bf16.msra.mxu2 %v1379_v14 }
 0xb14   :  { %v813_v55 = vpop.xlane.xlu1 %812 }
 0xb25   :  { %v807_v33 = vpop.xlane.xlu2 %806 }
 0xb26   :  { %1459 = vrcp.f32 %v807_v33 }
 0xb27   :  { %1461 = vrcp.f32 %v813_v55 }
 0xb28   :  { %1463 = vrcp.f32 %v810_v52 }
 0xb2c   :  { %v1460_v42 = vpop.eup %1459 }
 0xb2d   :  { %v827_v7 = vmul.f32 %v1460_v42, %v1448_v43  ;;  %v1462_v2 = vpop.eup %1461  ;;  %v1295_v43 = vor.u32 %v1373_v29, %v1294_v17 }
 0xb2e   :  { %v1464_v13 = vpop.eup %1463  ;;  %v829_v63 = vmul.f32 %v1462_v2, %v1446_v45 }
 0xb2f   :  { %v832_v18 = vpack.c.bf16 %v827_v7, %v826_v49  ;;  %v828_v6 = vmul.f32 %v1464_v13, %v1444_v26  ;;  %1007 = vmatpush.bf16.msrb.mxu1 %v1295_v43  ;;  %v1378_v7 = vld [vmem:[%s2029_s2 + $0x60] sm:$0xff]  ;;  %v1377_v13 = vld [vmem:[%s2029_s2 + $0x58] sm:$0xff] }
 0xb30   :  { %1086 = vmatpush.bf16.msra.mxu2 %v1378_v7 }
 0xb31   :  { %1269 = vmatmul.msk.bf16.gmra.mxu3 %vm230_vm8, %v832_v18  ;;  %v833_v59 = vpack.c.bf16 %v829_v63, %v828_v6 }
 0xb33   :  { %1008 = vmatpush.bf16.msrb.mxu1 %v1291_v36 }
 0xb34   :  { %1087 = vmatpush.bf16.msra.mxu2 %v1377_v13 }
 0xb41   :  { %1270 = vmatmul.msk.bf16.gmra.mxu3 %vm230_vm8, %v833_v59 }
 0xb77   :  { %v871_v15 = vpop.f32.mrf.mxu3 }
 0xb7f   :  { %v873_v4 = vpop.f32.mrf.mxu3 }
 0xb87   :  { %v876_v3 = vpop.f32.mrf.mxu3 }
 0xb88   :  { %v891_v58 = vadd.f32 %v876_v3, %v871_v15  ;;  %v933_v15 = vld [vmem:[%s2028_s3 + $0xb0] sm:$0xff] }
 0xb8f   :  { %v878_v16 = vpop.f32.mrf.mxu3 }
 0xb90   :  { %v892_v31 = vadd.f32 %v878_v16, %v873_v4  ;;  %v934_v4 = vld [vmem:[%s2028_s3 + $0xb8] sm:$0xff] }
 0xbb4   :  { %v881_v39 = vpop.f32.mrf.mxu3 }
 0xbb5   :  { %v893_v53 = vadd.f32 %v891_v58, %v881_v39  ;;  %v1375_v58 = vld [vmem:[%s2029_s2 + $0x48] sm:$0xff] }
 0xbbc   :  { %v883_v19 = vpop.f32.mrf.mxu3 }
 0xbbd   :  { %v894_v56 = vadd.f32 %v892_v31, %v883_v19  ;;  %v1374_v31 = vld [vmem:[%s2029_s2 + $0x40] sm:$0xff] }
 0xbc4   :  { %v886_v37 = vpop.f32.mrf.mxu3 }
 0xbc5   :  { %v895_v24 = vadd.f32 %v893_v53, %v886_v37  ;;  %v1376_v37 = vld [vmem:[%s2029_s2 + $0x50] sm:$0xff] }
 0xbc6   :  { %1088 = vmatpush.bf16.msra.mxu2 %v1376_v37 }
 0xbca   :  { %1089 = vmatpush.bf16.msra.mxu2 %v1375_v58 }
 0xbcc   :  { %v888_v32 = vpop.f32.mrf.mxu3 }
 0xbcd   :  { %v896_v22 = vadd.f32 %v894_v56, %v888_v32 }
 0xbce   :  { %1090 = vmatpush.bf16.msra.mxu2 %v1374_v31 }
 0xbcf   :  { %v897_v26 = vpack.c.bf16 %v896_v22, %v895_v24 }
 0xbd1   :  { %1283 = vmatmul.msk.bf16.vlgmr.msrb.gmra.mxu2 %vm38_vm0, %v897_v26 }
 0xc54   :  { %v926_v25 = vpop.f32.mrf.mxu2 }
 0xc55   :  { %v931_v5 = vadd.f32 %v926_v25, %v1838_v44 }
 0xc57   :  { %v935_v8 = vsel %vm38_vm0, %v931_v5, 0.0 }
 0xc58   :  { %936 = vadd.xlane.f32.xlu1 %v935_v8 }
 0xc5c   :  { %v928_v45 = vpop.f32.mrf.mxu2 }
 0xc5d   :  { %v932_v51 = vadd.f32 %v928_v45, %v1840_v47 }
 0xc5f   :  { %v938_v57 = vsel %vm38_vm0, %v932_v51, 0.0 }
 0xc60   :  { %939 = vadd.xlane.f32.xlu1 %v938_v57 }
 0xccb   :  { %v937_v44 = vpop.xlane.xlu1 %936 }
 0xccc   :  { %v941_v35 = vmul.f32 %v937_v44, %v1509_v10 }
 0xcce   :  { %v943_v20 = vsub.f32 %v931_v5, %v941_v35 }
 0xcd0   :  { %v945_v41 = vmul.f32 %v943_v20, %v943_v20 }
 0xcd2   :  { %v947_v47 = vsel %vm38_vm0, %v945_v41, 0.0 }
 0xcd3   :  { %948 = vadd.xlane.f32.xlu0 %v947_v47  ;;  %v940_v30 = vpop.xlane.xlu1 %939 }
 0xcd4   :  { %v942_v34 = vmul.f32 %v940_v30, %v1509_v10 }
 0xcd6   :  { %v944_v0 = vsub.f32 %v932_v51, %v942_v34  ;;  %v1351_v34 = vld [vmem:[%s2027_s1 + $0x2c] sm:$0xf] }
 0xcd8   :  { %v946_v62 = vmul.f32 %v944_v0, %v944_v0 }
 0xcda   :  { %v950_v1 = vsel %vm38_vm0, %v946_v62, 0.0 }
 0xcdb   :  { %951 = vadd.xlane.f32.xlu1 %v950_v1  ;;  %v1347_v1 = vld [vmem:[%s2027_s1 + $0xc] sm:$0xf] }
 0xcdc   :  { %v1348_v36 = vor.u32 %v1382_v21, %v1347_v1 }
 0xd46   :  { %v949_v50 = vpop.xlane.xlu0 %948 }
 0xd47   :  { %v953_v40 = vmul.f32 %v949_v50, %v1509_v10 }
 0xd49   :  { %v955_v48 = vadd.f32 1e-05, %v953_v40 }
 0xd4b   :  { %1465 = vrsqrt.f32 %v955_v48  ;;  %vm963_vm7 = vweird.f32 %v955_v48 }
 0xd4e   :  { %v952_v28 = vpop.xlane.xlu1 %951 }
 0xd4f   :  { %v954_v60 = vmul.f32 %v952_v28, %v1509_v10 }
 0xd51   :  { %v1466_v52 = vpop.eup %1465  ;;  %v956_v33 = vadd.f32 1e-05, %v954_v60 }
 0xd52   :  { %v958_v42 = vmul.f32 %v1466_v52, %v955_v48  ;;  %vm964_vm6 = vweird.f32 %v1466_v52 }
 0xd53   :  { %1467 = vrsqrt.f32 %v956_v33  ;;  %vm965_vm8 = vmor %vm963_vm7, %vm964_vm6  ;;  %vm973_vm10 = vweird.f32 %v956_v33 }
 0xd54   :  { %v959_v49 = vmul.f32 %v1466_v52, %v958_v42 }
 0xd56   :  { %v960_v55 = vmul.f32 0.5, %v959_v49 }
 0xd58   :  { %v961_v18 = vsub.f32 1.5, %v960_v55 }
 0xd59   :  { %v1468_v2 = vpop.eup %1467 }
 0xd5a   :  { %v968_v63 = vmul.f32 %v1468_v2, %v956_v33  ;;  %v962_v6 = vmul.f32 %v1466_v52, %v961_v18  ;;  %vm974_vm9 = vweird.f32 %v1468_v2 }
 0xd5b   :  { %vm975_vm11 = vmor %vm973_vm10, %vm974_vm9 }
 0xd5c   :  { %v969_v59 = vmul.f32 %v1468_v2, %v968_v63  ;;  %v966_v11 = vsel %vm965_vm8, %v1466_v52, %v962_v6 }
 0xd5d   :  { %v977_v27 = vmul.f32 %v966_v11, %v943_v20 }
 0xd5e   :  { %v970_v38 = vmul.f32 0.5, %v969_v59 }
 0xd5f   :  { %v979_v16 = vmul.f32 %v977_v27, %v933_v15 }
 0xd60   :  { %v971_v12 = vsub.f32 1.5, %v970_v38 }
 0xd62   :  { %v972_v23 = vmul.f32 %v1468_v2, %v971_v12 }
 0xd64   :  { %v976_v9 = vsel %vm975_vm11, %v1468_v2, %v972_v23 }
 0xd65   :  { %v978_v3 = vmul.f32 %v976_v9, %v944_v0  ;;  %v1383_v0 = vld [vmem:[%s2027_s1 + $0x38] sm:$0xf0] }
 0xd66   :  { %v1352_v62 = vor.u32 %v1383_v0, %v1351_v34 }
 0xd67   :  { %v980_v39 = vmul.f32 %v978_v3, %v934_v4 }
 0xd68   :  { %1169 = vmatpush.bf16.msra.mxu1 %v1352_v62 }
 0xd69   :  { %v981_v19 = vpack.c.bf16 %v980_v39, %v979_v16 }
 0xd6b   :  { %1296 = vmatmul.msk.bf16.vlgmr.msrb.gmra.mxu1 %vm38_vm0, %v981_v19 }
 0xd6c   :  { %1170 = vmatpush.bf16.msra.mxu1 %v1348_v36 }
 0xde8   :  { %v1010_v53 = vpop.f32.mrf.mxu1 }
 0xde9   :  { %v1015_v32 = vmax.f32 %v1010_v53, 0.0 }
 0xdf0   :  { %v1012_v56 = vpop.f32.mrf.mxu1 }
 0xdf1   :  { %v1016_v24 = vmax.f32 %v1012_v56, 0.0 }
 0xdf3   :  { %v1017_v22 = vpack.c.bf16 %v1016_v24, %v1015_v32 }
 0xdf5   :  { %1091 = vmatmul.bf16.vlgmr.msra.gmra.mxu2 %v1017_v22 }
 0xe78   :  { %v1092_v26 = vpop.f32.mrf.mxu2 }
 0xe79   :  { %v1097_v25 = vadd.f32 %v1092_v26, %v979_v16 }
 0xe7b   :  { %v1099_v5 = vsel %vm38_vm0, %v1097_v25, 0.0 }
 0xe7c   :  { %1100 = vadd.xlane.f32.xlu0 %v1099_v5 }
 0xe80   :  { %v1094_v8 = vpop.f32.mrf.mxu2 }
 0xe81   :  { %v1098_v45 = vadd.f32 %v1094_v8, %v980_v39 }
 0xe83   :  { %v1102_v51 = vsel %vm38_vm0, %v1098_v45, 0.0 }
 0xe84   :  { %1103 = vadd.xlane.f32.xlu2 %v1102_v51 }
 0xeef   :  { %v1101_v57 = vpop.xlane.xlu0 %1100 }
 0xef0   :  { %v1105_v17 = vmul.f32 %v1101_v57, %v1509_v10 }
 0xef2   :  { %v1107_v29 = vsub.f32 %v1097_v25, %v1105_v17 }
 0xef4   :  { %v1109_v43 = vmul.f32 %v1107_v29, %v1107_v29 }
 0xef6   :  { %v1111_v44 = vsel %vm38_vm0, %v1109_v43, 0.0 }
 0xef7   :  { %1112 = vadd.xlane.f32.xlu1 %v1111_v44  ;;  %v1104_v35 = vpop.xlane.xlu2 %1103 }
 0xef8   :  { %v1106_v20 = vmul.f32 %v1104_v35, %v1509_v10 }
 0xefa   :  { %v1108_v41 = vsub.f32 %v1098_v45, %v1106_v20 }
 0xefc   :  { %v1110_v47 = vmul.f32 %v1108_v41, %v1108_v41 }
 0xefe   :  { %v1114_v30 = vsel %vm38_vm0, %v1110_v47, 0.0 }
 0xeff   :  { %1115 = vadd.xlane.f32.xlu0 %v1114_v30 }
 0xf6a   :  { %v1113_v46 = vpop.xlane.xlu1 %1112 }
 0xf6b   :  { %v1117_v50 = vmul.f32 %v1113_v46, %v1509_v10 }
 0xf6d   :  { %v1119_v40 = vadd.f32 1e-05, %v1117_v50 }
 0xf6f   :  { %1469 = vrsqrt.f32 %v1119_v40  ;;  %vm1127_vm13 = vweird.f32 %v1119_v40 }
 0xf72   :  { %v1116_v48 = vpop.xlane.xlu0 %1115 }
 0xf73   :  { %v1118_v61 = vmul.f32 %v1116_v48, %v1509_v10 }
 0xf75   :  { %v1470_v54 = vpop.eup %1469  ;;  %v1120_v28 = vadd.f32 1e-05, %v1118_v61 }
 0xf76   :  { %v1122_v60 = vmul.f32 %v1470_v54, %v1119_v40  ;;  %vm1128_vm12 = vweird.f32 %v1470_v54 }
 0xf77   :  { %1471 = vrsqrt.f32 %v1120_v28  ;;  %vm1129_vm15 = vmor %vm1127_vm13, %vm1128_vm12  ;;  %vm1137_vm1 = vweird.f32 %v1120_v28 }
 0xf78   :  { %v1123_v52 = vmul.f32 %v1470_v54, %v1122_v60 }
 0xf7a   :  { %v1124_v33 = vmul.f32 0.5, %v1123_v52 }
 0xf7c   :  { %v1125_v42 = vsub.f32 1.5, %v1124_v33 }
 0xf7d   :  { %v1472_v14 = vpop.eup %1471 }
 0xf7e   :  { %v1132_v49 = vmul.f32 %v1472_v14, %v1120_v28  ;;  %v1126_v55 = vmul.f32 %v1470_v54, %v1125_v42  ;;  %vm1138_vm14 = vweird.f32 %v1472_v14 }
 0xf7f   :  { %vm1139_vm2 = vmor %vm1137_vm1, %vm1138_vm14 }
 0xf80   :  { %v1133_v7 = vmul.f32 %v1472_v14, %v1132_v49  ;;  %v1130_v13 = vsel %vm1129_vm15, %v1470_v54, %v1126_v55 }
 0xf81   :  { %v1141_v6 = vmul.f32 %v1130_v13, %v1107_v29 }
 0xf82   :  { %v1134_v18 = vmul.f32 0.5, %v1133_v7 }
 0xf84   :  { %v1135_v2 = vsub.f32 1.5, %v1134_v18 }
 0xf86   :  { %v1136_v63 = vmul.f32 %v1472_v14, %v1135_v2 }
 0xf88   :  { %v1140_v10 = vsel %vm1139_vm2, %v1472_v14, %v1136_v63 }
 0xf89   :  { %v1142_v59 = vmul.f32 %v1140_v10, %v1108_v41 }
 0xf8b   :  { %v1143_v38 = vpack.c.bf16 %v1142_v59, %v1141_v6 }
 0xf8d   :  { %1353 = vmatmul.msk.bf16.vlgmr.msra.gmra.mxu1 %vm38_vm0, %v1143_v38 }
0x100a   :  { %v1172_v11 = vpop.f32.mrf.mxu1 }
0x100b   :  { %1177 = vst [vmem:[%s2030_s4] sm:$0xff] %v1172_v11 }
0x1012   :  { %v1174_v12 = vpop.f32.mrf.mxu1 }
0x1013   :  { %1178 = vst [vmem:[%s2030_s4 + $0x8] sm:$0xff] %v1174_v12 }

</bundles_post_ra>
